<compile_context>
chip_gen: v7x
topology: tpu7x:2x2x1
jax: 0.10.0
libtpu: 0.0.40
codegen_flags: <defaults>
</compile_context>

<pallas_src>
import functools

import jax
import jax.numpy as jnp
from jax import lax
from jax.experimental import pallas as pl
from jax.experimental.pallas import tpu as pltpu


def _wkv7_chunk_kernel(r_ref, w_ref, k_ref, v_ref, a_ref, b_ref, s_in_ref,
                       x_ref, s_out_ref, s_scr, *, chunk, head_size,
                       heads_per_block, seq_len, mxu_dtype):
    C = chunk
    N = head_size
    HB = heads_per_block
    f32 = jnp.float32
    cd = mxu_dtype

    t_idx = pl.program_id(1)

    # Load incoming state into the VMEM carry at the first time-chunk.
    @pl.when(t_idx == 0)
    def _init():
        s_scr[...] = s_in_ref[...]

    # Whole (C, HB*N) chunk of every field (lane-dense).
    r_all = r_ref[...]
    w_all = w_ref[...]
    k_all = k_ref[...]
    v_all = v_ref[...]
    a_all = a_ref[...]
    b_all = b_ref[...]

    # Ragged tail chunk: mask rows >= seq_len (seq_len is static).  The
    # pipeline leaves stale data in the out-of-range rows of the VMEM buffer;
    # masked rows become a neutral step (w=1, everything else 0).
    if seq_len % C != 0:
        rows_left = seq_len - t_idx * C
        valid = lax.broadcasted_iota(jnp.int32, (C, 1), 0) < rows_left
        w_all = jnp.where(valid, w_all, 1.0)
        r_all = jnp.where(valid, r_all, 0.0)
        k_all = jnp.where(valid, k_all, 0.0)
        v_all = jnp.where(valid, v_all, 0.0)
        a_all = jnp.where(valid, a_all, 0.0)
        b_all = jnp.where(valid, b_all, 0.0)

    # Triangular masks shared across heads.
    row = lax.broadcasted_iota(jnp.int32, (C, C), 0)
    col = lax.broadcasted_iota(jnp.int32, (C, C), 1)
    strict = row > col          # source s strictly before target t
    incl = row >= col           # source s at or before target t
    ones_incl = incl.astype(f32)
    zero_cc = jnp.zeros((C, C), f32)

    def mm(x, y):
        return jnp.dot(x, y, preferred_element_type=f32)

    def mm_nt(x, y):  # x @ y.T  (contract last dims)
        return lax.dot_general(x, y, (((1,), (1,)), ((), ())),
                               preferred_element_type=f32)

    def mm_tn(x, y):  # x.T @ y  (contract first dims)
        return lax.dot_general(x, y, (((0,), (0,)), ((), ())),
                               preferred_element_type=f32)

    # ---- decay math (f32, whole block) -------------------------------------
    lw = jnp.log(w_all)                  # (C, HB*N)
    g = mm(ones_incl, lw)                # inclusive cumsum_t log w (MXU, f32)
    g_prev = g - lw                      # exclusive cumsum (d_{t-1})
    g_tot = g[C - 1:C, :]                # (1, HB*N) total chunk log-decay
    gh = 0.5 * g_tot                     # symmetric split -> bounded exponents

    e_g = jnp.exp(g)                     # <= 1
    e_gp = jnp.exp(g_prev)               # <= 1
    e_gtg = jnp.exp(g_tot - g)           # <= 1  (shared by b_out / k_out)
    e_nh = jnp.exp(-gh)                  # (1, HB*N)
    e_gt = jnp.exp(g_tot)                # (1, HB*N)
    e_ghg = e_gtg * e_nh                 # = exp(gh - g) (shared by b_dn / k_dn)

    r_in_f = r_all * e_g                 # d_t * r_t
    a_in_f = a_all * e_gp                # d_{t-1} * a_t
    r_up = (r_in_f * e_nh).astype(cd)
    a_up = (a_in_f * e_nh).astype(cd)
    b_dn = (b_all * e_ghg).astype(cd)
    k_dn = (k_all * e_ghg).astype(cd)
    b_out = (b_all * e_gtg).astype(cd)   # (d_C/d_s) * b_s
    k_out = (k_all * e_gtg).astype(cd)   # (d_C/d_s) * k_s
    r_in = r_in_f.astype(cd)
    a_in = a_in_f.astype(cd)
    v_c = v_all.astype(cd)

    n_doubling = max(1, (C - 1).bit_length())

    for h in range(HB):
        sl = slice(h * N, (h + 1) * N)
        s0 = s_scr[h]                    # (N, N) f32: rows = value, cols = key
        s0_c = s0.astype(cd)

        # Pairwise decay-weighted inner products (MXU), then triangular mask.
        att_ab = jnp.where(strict, mm_nt(a_up[:, sl], b_dn[:, sl]), zero_cc)
        att_ak = jnp.where(strict, mm_nt(a_up[:, sl], k_dn[:, sl]), zero_cc)
        att_rb = jnp.where(incl, mm_nt(r_up[:, sl], b_dn[:, sl]), zero_cc)
        att_rk = jnp.where(incl, mm_nt(r_up[:, sl], k_dn[:, sl]), zero_cc)

        vh = v_c[:, sl]
        # z_t = S_{t-1} a_t for the whole chunk:
        #   (I - A) Z = a_in @ S0^T + att_ak @ V,  A strictly lower triangular.
        rhs = mm_nt(a_in[:, sl], s0_c) + mm(att_ak.astype(cd), vh)
        # (I - A)^{-1} = (I+A)(I+A^2)(I+A^4)...  (A nilpotent, A^C = 0)
        z = rhs + mm(att_ab.astype(cd), rhs.astype(cd))
        xp = att_ab
        for _ in range(n_doubling - 1):
            xp_c = xp.astype(cd)
            xp = mm(xp_c, xp_c)
            z = z + mm(xp.astype(cd), z.astype(cd))
        z_c = z.astype(cd)

        # Outputs: x_t = S_t r_t for every t in the chunk.
        x_h = (mm_nt(r_in[:, sl], s0_c)
               + mm(att_rb.astype(cd), z_c)
               + mm(att_rk.astype(cd), vh))
        x_ref[:, sl] = x_h.astype(x_ref.dtype)

        # Final state of the chunk:
        #   S_C = S_0 diag(d_C) + sum_s z_s b_out_s^T + sum_s v_s k_out_s^T
        s_scr[h] = (s0 * e_gt[:, sl]
                    + mm_tn(z_c, b_out[:, sl])
                    + mm_tn(vh, k_out[:, sl]))

    @pl.when(t_idx == pl.num_programs(1) - 1)
    def _finalize():
        s_out_ref[...] = s_scr[...]


def wkv7_forward(seq_length, r, w, k, v, a, b, state2, *, num_heads, head_size,
                 chunk_size=64, heads_per_block=None, mxu_dtype=jnp.bfloat16):
    """Matches Wkv7.forward (custom_wkv=False) semantics.

    r/w/k/v/a/b: anything reshapeable to (T, num_heads*head_size)
    state2:      (num_heads, head_size, head_size)
    returns (x: (T, H, 1, N), state2_out: (H, N, N))

    chunk_size * max|log w| must stay below ~176 (exp-overflow bound of the
    symmetric decay split).  Fine up to chunk ~256 for real RWKV-7 decay.
    """
    T, H, N = int(seq_length), int(num_heads), int(head_size)
    f32 = jnp.float32

    def flat(x):
        return jnp.asarray(x, f32).reshape(T, H * N)

    r2, w2, k2, v2, a2, b2 = (flat(t) for t in (r, w, k, v, a, b))
    s2 = jnp.asarray(state2, f32).reshape(H, N, N)

    # Heads per grid step: blocks are a multiple of 128 lanes; use 256-lane
    # blocks when enough heads remain to keep >=2 head blocks (v7x: 2 TCs
    # share the "parallel" head axis).
    if heads_per_block is None:
        if N < 128 and 128 % N == 0:
            base = 128 // N
            HB = base
            if H % (2 * base) == 0 and H // (2 * base) >= 2:
                HB = 2 * base
        elif N % 128 == 0:
            HB = 1
        else:
            HB = H          # irregular head size: one block spans all heads
    else:
        HB = int(heads_per_block)
    HB = max(1, min(HB, H))
    Hp = -(-H // HB) * HB

    # Pad heads only when H is not a multiple of HB (rare).
    if Hp != H:
        padn = (Hp - H) * N
        zpad = jnp.zeros((T, padn), f32)
        wpad = jnp.ones((T, padn), f32)       # neutral decay
        r2 = jnp.concatenate([r2, zpad], axis=1)
        w2 = jnp.concatenate([w2, wpad], axis=1)
        k2 = jnp.concatenate([k2, zpad], axis=1)
        v2 = jnp.concatenate([v2, zpad], axis=1)
        a2 = jnp.concatenate([a2, zpad], axis=1)
        b2 = jnp.concatenate([b2, zpad], axis=1)
        s2 = jnp.concatenate([s2, jnp.zeros((Hp - H, N, N), f32)], axis=0)

    # Time chunking: no wrapper-side padding; the ragged tail chunk is masked
    # in-kernel (T is static).
    C = min(int(chunk_size), T)
    if C < T and C % 8 != 0:
        C = -(-C // 8) * 8          # keep the sublane dim 8-aligned
    n_tblk = -(-T // C)
    n_hblk = Hp // HB
    HBN = HB * N

    seq_spec = pl.BlockSpec((C, HBN), lambda hh, tt: (tt, hh))
    st_spec = pl.BlockSpec((HB, N, N), lambda hh, tt: (hh, 0, 0))

    kernel = functools.partial(
        _wkv7_chunk_kernel, chunk=C, head_size=N, heads_per_block=HB,
        seq_len=T, mxu_dtype=mxu_dtype)

    x_flat, s_out = pl.pallas_call(
        kernel,
        out_shape=(
            jax.ShapeDtypeStruct((T, Hp * N), f32),
            jax.ShapeDtypeStruct((Hp, N, N), f32),
        ),
        grid_spec=pltpu.PrefetchScalarGridSpec(
            num_scalar_prefetch=0,
            grid=(n_hblk, n_tblk),
            in_specs=[seq_spec] * 6 + [st_spec],
            out_specs=(seq_spec, st_spec),
            scratch_shapes=[pltpu.VMEM((HB, N, N), jnp.float32)],
        ),
        compiler_params=pltpu.CompilerParams(
            dimension_semantics=("parallel", "arbitrary")),
        input_output_aliases={6: 1},
    )(r2, w2, k2, v2, a2, b2, s2)

    if Hp != H:
        x_flat = x_flat[:, : H * N]
        s_out = s_out[:H]
    x = x_flat.reshape(T, H, 1, N)
    return x, s_out


def _reference_wkv7(T, H, N, r, w, k, v, a, b, state2):
    """Pure-JAX reference mirroring the PyTorch per-step loop exactly."""
    r = r.reshape(T, H, N)
    w = w.reshape(T, H, N)
    k = k.reshape(T, H, N)
    v = v.reshape(T, H, N)
    a = a.reshape(T, H, N)
    b = b.reshape(T, H, N)

    def step(s, inp):
        r_t, w_t, k_t, v_t, a_t, b_t = inp
        kv = v_t[:, :, None] * k_t[:, None, :]
        sa = jnp.einsum("hij,hj->hi", s, a_t)
        s = s * w_t[:, None, :] + sa[:, :, None] * b_t[:, None, :] + kv
        x_t = jnp.einsum("hij,hj->hi", s, r_t)
        return s, x_t

    s_out, xs = lax.scan(step, state2, (r, w, k, v, a, b))
    return xs.reshape(T, H, 1, N), s_out


if __name__ == "__main__":
    base_key = jax.random.PRNGKey(0)

    def make_inputs(T, H, N, case_idx):
        key = jax.random.fold_in(base_key, case_idx)
        ks = jax.random.split(key, 7)
        r = jax.random.normal(ks[0], (T, H * N), dtype=jnp.float32) * 0.5
        # decay-like values in (0, 1), as in RWKV7
        w = jnp.exp(-jnp.exp(
            jax.random.normal(ks[1], (T, H * N), dtype=jnp.float32) * 0.5 - 0.5))
        k = jax.random.normal(ks[2], (T, H * N), dtype=jnp.float32) * 0.5
        v = jax.random.normal(ks[3], (T, H * N), dtype=jnp.float32) * 0.5
        a = jax.random.normal(ks[4], (T, H * N), dtype=jnp.float32) * 0.1
        b = jax.random.normal(ks[5], (T, H * N), dtype=jnp.float32) * 0.1
        state2 = jax.random.normal(ks[6], (H, N, N), dtype=jnp.float32) * 0.1
        return r, w, k, v, a, b, state2

    def run_case(T, H, N, case_idx, chunk_size, mxu_dtype, tol_kind):
        r, w, k, v, a, b, state2 = make_inputs(T, H, N, case_idx)
        x_ref, s_ref = _reference_wkv7(T, H, N, r, w, k, v, a, b, state2)

        x, s_out = wkv7_forward(T, r, w, k, v, a, b, state2,
                                num_heads=H, head_size=N,
                                chunk_size=chunk_size, mxu_dtype=mxu_dtype)
        x = jax.block_until_ready(x)
        s_out = jax.block_until_ready(s_out)

        assert x.shape == (T, H, 1, N)
        assert s_out.shape == (H, N, N)

        tag = f"(T={T}, H={H}, chunk={chunk_size}, dtype={mxu_dtype.__name__})"
        if tol_kind == "tight":
            assert jnp.allclose(x, x_ref, atol=1e-3, rtol=1e-3), f"x mismatch {tag}"
            assert jnp.allclose(s_out, s_ref, atol=1e-3, rtol=1e-3), \
                f"state mismatch {tag}"
        else:
            def rel_err(got, ref):
                return float(jnp.max(jnp.abs(got - ref))
                             / (jnp.max(jnp.abs(ref)) + 1e-6))
            ex = rel_err(x, x_ref)
            es = rel_err(s_out, s_ref)
            assert ex < 5e-2, f"x mismatch {tag}: rel err {ex}"
            assert es < 5e-2, f"state mismatch {tag}: rel err {es}"

    # f32 MXU path, tight tol: multi-chunk carry + ragged tail + head pairs.
    run_case(T=40, H=4, N=64, case_idx=0, chunk_size=16,
             mxu_dtype=jnp.float32, tol_kind="tight")
    # f32 MXU path, tight tol: odd head count (padded), single chunk covers T.
    run_case(T=24, H=3, N=64, case_idx=1, chunk_size=64,
             mxu_dtype=jnp.float32, tol_kind="tight")
    # bf16 MXU path (default): chunk 64, 4 heads per block, ragged tail.
    run_case(T=72, H=16, N=64, case_idx=2, chunk_size=64,
             mxu_dtype=jnp.bfloat16, tol_kind="loose")
    # bf16 MXU path: single-token decode step (seq_length == 1 branch).
    run_case(T=1, H=4, N=64, case_idx=3, chunk_size=64,
             mxu_dtype=jnp.bfloat16, tol_kind="loose")

    print("KERNEL_OK")
</pallas_src>

<mosaic_0001>
module attributes {stable_mosaic.version = 11 : i64} {
  func.func @_wkv7_chunk_kernel(%arg0: i32, %arg1: i32, %arg2: memref<16x128xf32, #tpu.memory_space<vmem>>, %arg3: memref<16x128xf32, #tpu.memory_space<vmem>>, %arg4: memref<16x128xf32, #tpu.memory_space<vmem>>, %arg5: memref<16x128xf32, #tpu.memory_space<vmem>>, %arg6: memref<16x128xf32, #tpu.memory_space<vmem>>, %arg7: memref<16x128xf32, #tpu.memory_space<vmem>>, %arg8: memref<2x64x64xf32, #tpu.memory_space<vmem>>, %arg9: memref<16x128xf32, #tpu.memory_space<vmem>>, %arg10: memref<2x64x64xf32, #tpu.memory_space<vmem>>, %arg11: memref<2x64x64xf32, #tpu.memory_space<vmem>>) attributes {dimension_semantics = [#tpu.dimension_semantics<parallel>, #tpu.dimension_semantics<arbitrary>], iteration_bounds = array<i64: 2, 3>, scalar_prefetch = 0 : i64, scratch_operands = 1 : i64, tpu.core_type = #tpu.core_type<tc>, window_params = [{transform_indices = @transform_0, window_bounds = array<i64: 16, 128>}, {transform_indices = @transform_1, window_bounds = array<i64: 16, 128>}, {transform_indices = @transform_2, window_bounds = array<i64: 16, 128>}, {transform_indices = @transform_3, window_bounds = array<i64: 16, 128>}, {transform_indices = @transform_4, window_bounds = array<i64: 16, 128>}, {transform_indices = @transform_5, window_bounds = array<i64: 16, 128>}, {transform_indices = @transform_6, window_bounds = array<i64: 2, 64, 64>}, {transform_indices = @transform_7, window_bounds = array<i64: 16, 128>}, {transform_indices = @transform_8, window_bounds = array<i64: 2, 64, 64>}]} {
    %c0_i32 = arith.constant 0 : i32
    %0 = arith.cmpi eq, %arg1, %c0_i32 : i32
    %1 = arith.extui %0 : i1 to i32
    %c0_i32_0 = arith.constant 0 : i32
    %2 = arith.cmpi ne, %1, %c0_i32_0 : i32
    scf.if %2 {
      %c0_72 = arith.constant 0 : index
      %c0_73 = arith.constant 0 : index
      %c0_74 = arith.constant 0 : index
      %181 = vector.load %arg8[%c0_72, %c0_73, %c0_74] : memref<2x64x64xf32, #tpu.memory_space<vmem>>, vector<2x64x64xf32>
      %c0_75 = arith.constant 0 : index
      %c0_76 = arith.constant 0 : index
      %c0_77 = arith.constant 0 : index
      %182 = vector.load %arg11[%c0_75, %c0_76, %c0_77] : memref<2x64x64xf32, #tpu.memory_space<vmem>>, vector<2x64x64xf32>
      tpu.vector_store %arg11[%c0_75, %c0_76, %c0_77], %181 {strides = array<i32>} : memref<2x64x64xf32, #tpu.memory_space<vmem>>, vector<2x64x64xf32>,
    } else {
    }
    %c0 = arith.constant 0 : index
    %c0_1 = arith.constant 0 : index
    %3 = vector.load %arg2[%c0, %c0_1] : memref<16x128xf32, #tpu.memory_space<vmem>>, vector<16x128xf32>
    %c0_2 = arith.constant 0 : index
    %c0_3 = arith.constant 0 : index
    %4 = vector.load %arg3[%c0_2, %c0_3] : memref<16x128xf32, #tpu.memory_space<vmem>>, vector<16x128xf32>
    %c0_4 = arith.constant 0 : index
    %c0_5 = arith.constant 0 : index
    %5 = vector.load %arg4[%c0_4, %c0_5] : memref<16x128xf32, #tpu.memory_space<vmem>>, vector<16x128xf32>
    %c0_6 = arith.constant 0 : index
    %c0_7 = arith.constant 0 : index
    %6 = vector.load %arg5[%c0_6, %c0_7] : memref<16x128xf32, #tpu.memory_space<vmem>>, vector<16x128xf32>
    %c0_8 = arith.constant 0 : index
    %c0_9 = arith.constant 0 : index
    %7 = vector.load %arg6[%c0_8, %c0_9] : memref<16x128xf32, #tpu.memory_space<vmem>>, vector<16x128xf32>
    %c0_10 = arith.constant 0 : index
    %c0_11 = arith.constant 0 : index
    %8 = vector.load %arg7[%c0_10, %c0_11] : memref<16x128xf32, #tpu.memory_space<vmem>>, vector<16x128xf32>
    %c16_i32 = arith.constant 16 : i32
    %9 = arith.muli %arg1, %c16_i32 : i32
    %c40_i32 = arith.constant 40 : i32
    %10 = arith.subi %c40_i32, %9 : i32
    %11 = tpu.iota {dimensions = array<i32: 0>} : vector<16x1xi32>
    %12 = vector.broadcast %10 : i32 to vector<16x1xi32>
    %13 = arith.cmpi slt, %11, %12 : vector<16x1xi32>
    %cst = arith.constant 1.000000e+00 : f32
    %14 = vector.shape_cast %13 : vector<16x1xi1> to vector<16x1xi1>
    %15 = vector.broadcast %14 : vector<16x1xi1> to vector<16x128xi1>
    %16 = vector.broadcast %cst : f32 to vector<16x128xf32>
    %17 = arith.select %15, %4, %16 : vector<16x128xi1>, vector<16x128xf32>
    %cst_12 = arith.constant 0.000000e+00 : f32
    %18 = vector.shape_cast %13 : vector<16x1xi1> to vector<16x1xi1>
    %19 = vector.broadcast %18 : vector<16x1xi1> to vector<16x128xi1>
    %20 = vector.broadcast %cst_12 : f32 to vector<16x128xf32>
    %21 = arith.select %19, %3, %20 : vector<16x128xi1>, vector<16x128xf32>
    %cst_13 = arith.constant 0.000000e+00 : f32
    %22 = vector.shape_cast %13 : vector<16x1xi1> to vector<16x1xi1>
    %23 = vector.broadcast %22 : vector<16x1xi1> to vector<16x128xi1>
    %24 = vector.broadcast %cst_13 : f32 to vector<16x128xf32>
    %25 = arith.select %23, %5, %24 : vector<16x128xi1>, vector<16x128xf32>
    %cst_14 = arith.constant 0.000000e+00 : f32
    %26 = vector.shape_cast %13 : vector<16x1xi1> to vector<16x1xi1>
    %27 = vector.broadcast %26 : vector<16x1xi1> to vector<16x128xi1>
    %28 = vector.broadcast %cst_14 : f32 to vector<16x128xf32>
    %29 = arith.select %27, %6, %28 : vector<16x128xi1>, vector<16x128xf32>
    %cst_15 = arith.constant 0.000000e+00 : f32
    %30 = vector.shape_cast %13 : vector<16x1xi1> to vector<16x1xi1>
    %31 = vector.broadcast %30 : vector<16x1xi1> to vector<16x128xi1>
    %32 = vector.broadcast %cst_15 : f32 to vector<16x128xf32>
    %33 = arith.select %31, %7, %32 : vector<16x128xi1>, vector<16x128xf32>
    %cst_16 = arith.constant 0.000000e+00 : f32
    %34 = vector.shape_cast %13 : vector<16x1xi1> to vector<16x1xi1>
    %35 = vector.broadcast %34 : vector<16x1xi1> to vector<16x128xi1>
    %36 = vector.broadcast %cst_16 : f32 to vector<16x128xf32>
    %37 = arith.select %35, %8, %36 : vector<16x128xi1>, vector<16x128xf32>
    %38 = tpu.iota {dimensions = array<i32: 0>} : vector<16x16xi32>
    %39 = tpu.iota {dimensions = array<i32: 1>} : vector<16x16xi32>
    %40 = arith.cmpi sgt, %38, %39 : vector<16x16xi32>
    %41 = arith.cmpi sge, %38, %39 : vector<16x16xi32>
    %42 = arith.extui %41 : vector<16x16xi1> to vector<16x16xi32>
    %43 = arith.sitofp %42 : vector<16x16xi32> to vector<16x16xf32>
    %cst_17 = arith.constant 0.000000e+00 : f32
    %44 = vector.broadcast %cst_17 : f32 to vector<16x16xf32>
    %45 = math.log %17 : vector<16x128xf32>
    %cst_18 = arith.constant dense<0.000000e+00> : vector<16x128xf32>
    %46 = tpu.matmul %43, %45, %cst_18 {dimension_numbers = #tpu.dot_dimension_numbers<[1], [0], [0], [1], [0, 0, 1, 1], [], []>} : vector<16x16xf32>, vector<16x128xf32>, vector<16x128xf32> -> vector<16x128xf32>
    %47 = arith.subf %46, %45 : vector<16x128xf32>
    %48 = vector.extract_strided_slice %46 {offsets = [15, 0], sizes = [1, 128], strides = [1, 1]} : vector<16x128xf32> to vector<1x128xf32>
    %cst_19 = arith.constant 5.000000e-01 : f32
    %49 = vector.broadcast %cst_19 : f32 to vector<1x128xf32>
    %50 = arith.mulf %49, %48 : vector<1x128xf32>
    %51 = math.exp %46 : vector<16x128xf32>
    %52 = math.exp %47 : vector<16x128xf32>
    %53 = vector.broadcast %48 : vector<1x128xf32> to vector<16x128xf32>
    %54 = arith.subf %53, %46 : vector<16x128xf32>
    %55 = math.exp %54 : vector<16x128xf32>
    %cst_20 = arith.constant 0.000000e+00 : f32
    %56 = vector.broadcast %cst_20 : f32 to vector<1x128xf32>
    %57 = arith.subf %56, %50 : vector<1x128xf32>
    %58 = math.exp %57 : vector<1x128xf32>
    %59 = math.exp %48 : vector<1x128xf32>
    %60 = vector.broadcast %58 : vector<1x128xf32> to vector<16x128xf32>
    %61 = arith.mulf %55, %60 : vector<16x128xf32>
    %62 = arith.mulf %21, %51 : vector<16x128xf32>
    %63 = arith.mulf %33, %52 : vector<16x128xf32>
    %64 = vector.broadcast %58 : vector<1x128xf32> to vector<16x128xf32>
    %65 = arith.mulf %62, %64 : vector<16x128xf32>
    %66 = vector.broadcast %58 : vector<1x128xf32> to vector<16x128xf32>
    %67 = arith.mulf %63, %66 : vector<16x128xf32>
    %68 = arith.mulf %37, %61 : vector<16x128xf32>
    %69 = arith.mulf %25, %61 : vector<16x128xf32>
    %70 = arith.mulf %37, %55 : vector<16x128xf32>
    %71 = arith.mulf %25, %55 : vector<16x128xf32>
    %c0_21 = arith.constant 0 : index
    %c0_22 = arith.constant 0 : index
    %c0_23 = arith.constant 0 : index
    %72 = vector.load %arg11[%c0_21, %c0_22, %c0_23] : memref<2x64x64xf32, #tpu.memory_space<vmem>>, vector<1x64x64xf32>
    %73 = vector.shape_cast %72 : vector<1x64x64xf32> to vector<64x64xf32>
    %74 = vector.extract_strided_slice %67 {offsets = [0, 0], sizes = [16, 64], strides = [1, 1]} : vector<16x128xf32> to vector<16x64xf32>
    %75 = vector.extract_strided_slice %68 {offsets = [0, 0], sizes = [16, 64], strides = [1, 1]} : vector<16x128xf32> to vector<16x64xf32>
    %cst_24 = arith.constant dense<0.000000e+00> : vector<16x16xf32>
    %76 = tpu.matmul %74, %75, %cst_24 {dimension_numbers = #tpu.dot_dimension_numbers<[1], [1], [0], [0], [0, 0, 1, 0], [], []>} : vector<16x64xf32>, vector<16x64xf32>, vector<16x16xf32> -> vector<16x16xf32>
    %77 = arith.select %40, %76, %44 : vector<16x16xi1>, vector<16x16xf32>
    %78 = vector.extract_strided_slice %67 {offsets = [0, 0], sizes = [16, 64], strides = [1, 1]} : vector<16x128xf32> to vector<16x64xf32>
    %79 = vector.extract_strided_slice %69 {offsets = [0, 0], sizes = [16, 64], strides = [1, 1]} : vector<16x128xf32> to vector<16x64xf32>
    %cst_25 = arith.constant dense<0.000000e+00> : vector<16x16xf32>
    %80 = tpu.matmul %78, %79, %cst_25 {dimension_numbers = #tpu.dot_dimension_numbers<[1], [1], [0], [0], [0, 0, 1, 0], [], []>} : vector<16x64xf32>, vector<16x64xf32>, vector<16x16xf32> -> vector<16x16xf32>
    %81 = arith.select %40, %80, %44 : vector<16x16xi1>, vector<16x16xf32>
    %82 = vector.extract_strided_slice %65 {offsets = [0, 0], sizes = [16, 64], strides = [1, 1]} : vector<16x128xf32> to vector<16x64xf32>
    %83 = vector.extract_strided_slice %68 {offsets = [0, 0], sizes = [16, 64], strides = [1, 1]} : vector<16x128xf32> to vector<16x64xf32>
    %cst_26 = arith.constant dense<0.000000e+00> : vector<16x16xf32>
    %84 = tpu.matmul %82, %83, %cst_26 {dimension_numbers = #tpu.dot_dimension_numbers<[1], [1], [0], [0], [0, 0, 1, 0], [], []>} : vector<16x64xf32>, vector<16x64xf32>, vector<16x16xf32> -> vector<16x16xf32>
    %85 = arith.select %41, %84, %44 : vector<16x16xi1>, vector<16x16xf32>
    %86 = vector.extract_strided_slice %65 {offsets = [0, 0], sizes = [16, 64], strides = [1, 1]} : vector<16x128xf32> to vector<16x64xf32>
    %87 = vector.extract_strided_slice %69 {offsets = [0, 0], sizes = [16, 64], strides = [1, 1]} : vector<16x128xf32> to vector<16x64xf32>
    %cst_27 = arith.constant dense<0.000000e+00> : vector<16x16xf32>
    %88 = tpu.matmul %86, %87, %cst_27 {dimension_numbers = #tpu.dot_dimension_numbers<[1], [1], [0], [0], [0, 0, 1, 0], [], []>} : vector<16x64xf32>, vector<16x64xf32>, vector<16x16xf32> -> vector<16x16xf32>
    %89 = arith.select %41, %88, %44 : vector<16x16xi1>, vector<16x16xf32>
    %90 = vector.extract_strided_slice %29 {offsets = [0, 0], sizes = [16, 64], strides = [1, 1]} : vector<16x128xf32> to vector<16x64xf32>
    %91 = vector.extract_strided_slice %63 {offsets = [0, 0], sizes = [16, 64], strides = [1, 1]} : vector<16x128xf32> to vector<16x64xf32>
    %cst_28 = arith.constant dense<0.000000e+00> : vector<16x64xf32>
    %92 = tpu.matmul %91, %73, %cst_28 {dimension_numbers = #tpu.dot_dimension_numbers<[1], [1], [0], [0], [0, 0, 1, 0], [], []>} : vector<16x64xf32>, vector<64x64xf32>, vector<16x64xf32> -> vector<16x64xf32>
    %cst_29 = arith.constant dense<0.000000e+00> : vector<16x64xf32>
    %93 = tpu.matmul %81, %90, %cst_29 {dimension_numbers = #tpu.dot_dimension_numbers<[1], [0], [0], [1], [0, 0, 1, 1], [], []>} : vector<16x16xf32>, vector<16x64xf32>, vector<16x64xf32> -> vector<16x64xf32>
    %94 = arith.addf %92, %93 : vector<16x64xf32>
    %cst_30 = arith.constant dense<0.000000e+00> : vector<16x64xf32>
    %95 = tpu.matmul %77, %94, %cst_30 {dimension_numbers = #tpu.dot_dimension_numbers<[1], [0], [0], [1], [0, 0, 1, 1], [], []>} : vector<16x16xf32>, vector<16x64xf32>, vector<16x64xf32> -> vector<16x64xf32>
    %96 = arith.addf %94, %95 : vector<16x64xf32>
    %cst_31 = arith.constant dense<0.000000e+00> : vector<16x16xf32>
    %97 = tpu.matmul %77, %77, %cst_31 {dimension_numbers = #tpu.dot_dimension_numbers<[1], [0], [0], [1], [0, 0, 1, 1], [], []>} : vector<16x16xf32>, vector<16x16xf32>, vector<16x16xf32> -> vector<16x16xf32>
    %cst_32 = arith.constant dense<0.000000e+00> : vector<16x64xf32>
    %98 = tpu.matmul %97, %96, %cst_32 {dimension_numbers = #tpu.dot_dimension_numbers<[1], [0], [0], [1], [0, 0, 1, 1], [], []>} : vector<16x16xf32>, vector<16x64xf32>, vector<16x64xf32> -> vector<16x64xf32>
    %99 = arith.addf %96, %98 : vector<16x64xf32>
    %cst_33 = arith.constant dense<0.000000e+00> : vector<16x16xf32>
    %100 = tpu.matmul %97, %97, %cst_33 {dimension_numbers = #tpu.dot_dimension_numbers<[1], [0], [0], [1], [0, 0, 1, 1], [], []>} : vector<16x16xf32>, vector<16x16xf32>, vector<16x16xf32> -> vector<16x16xf32>
    %cst_34 = arith.constant dense<0.000000e+00> : vector<16x64xf32>
    %101 = tpu.matmul %100, %99, %cst_34 {dimension_numbers = #tpu.dot_dimension_numbers<[1], [0], [0], [1], [0, 0, 1, 1], [], []>} : vector<16x16xf32>, vector<16x64xf32>, vector<16x64xf32> -> vector<16x64xf32>
    %102 = arith.addf %99, %101 : vector<16x64xf32>
    %cst_35 = arith.constant dense<0.000000e+00> : vector<16x16xf32>
    %103 = tpu.matmul %100, %100, %cst_35 {dimension_numbers = #tpu.dot_dimension_numbers<[1], [0], [0], [1], [0, 0, 1, 1], [], []>} : vector<16x16xf32>, vector<16x16xf32>, vector<16x16xf32> -> vector<16x16xf32>
    %cst_36 = arith.constant dense<0.000000e+00> : vector<16x64xf32>
    %104 = tpu.matmul %103, %102, %cst_36 {dimension_numbers = #tpu.dot_dimension_numbers<[1], [0], [0], [1], [0, 0, 1, 1], [], []>} : vector<16x16xf32>, vector<16x64xf32>, vector<16x64xf32> -> vector<16x64xf32>
    %105 = arith.addf %102, %104 : vector<16x64xf32>
    %106 = vector.extract_strided_slice %62 {offsets = [0, 0], sizes = [16, 64], strides = [1, 1]} : vector<16x128xf32> to vector<16x64xf32>
    %cst_37 = arith.constant dense<0.000000e+00> : vector<16x64xf32>
    %107 = tpu.matmul %106, %73, %cst_37 {dimension_numbers = #tpu.dot_dimension_numbers<[1], [1], [0], [0], [0, 0, 1, 0], [], []>} : vector<16x64xf32>, vector<64x64xf32>, vector<16x64xf32> -> vector<16x64xf32>
    %cst_38 = arith.constant dense<0.000000e+00> : vector<16x64xf32>
    %108 = tpu.matmul %85, %105, %cst_38 {dimension_numbers = #tpu.dot_dimension_numbers<[1], [0], [0], [1], [0, 0, 1, 1], [], []>} : vector<16x16xf32>, vector<16x64xf32>, vector<16x64xf32> -> vector<16x64xf32>
    %109 = arith.addf %107, %108 : vector<16x64xf32>
    %cst_39 = arith.constant dense<0.000000e+00> : vector<16x64xf32>
    %110 = tpu.matmul %89, %90, %cst_39 {dimension_numbers = #tpu.dot_dimension_numbers<[1], [0], [0], [1], [0, 0, 1, 1], [], []>} : vector<16x16xf32>, vector<16x64xf32>, vector<16x64xf32> -> vector<16x64xf32>
    %111 = arith.addf %109, %110 : vector<16x64xf32>
    %c0_40 = arith.constant 0 : index
    %c0_41 = arith.constant 0 : index
    %112 = vector.load %arg9[%c0_40, %c0_41] : memref<16x128xf32, #tpu.memory_space<vmem>>, vector<16x64xf32>
    tpu.vector_store %arg9[%c0_40, %c0_41], %111 {strides = array<i32>} : memref<16x128xf32, #tpu.memory_space<vmem>>, vector<16x64xf32>,
    %113 = vector.extract_strided_slice %59 {offsets = [0, 0], sizes = [1, 64], strides = [1, 1]} : vector<1x128xf32> to vector<1x64xf32>
    %114 = vector.broadcast %113 : vector<1x64xf32> to vector<64x64xf32>
    %115 = arith.mulf %73, %114 : vector<64x64xf32>
    %116 = vector.extract_strided_slice %70 {offsets = [0, 0], sizes = [16, 64], strides = [1, 1]} : vector<16x128xf32> to vector<16x64xf32>
    %cst_42 = arith.constant dense<0.000000e+00> : vector<64x64xf32>
    %117 = tpu.matmul %105, %116, %cst_42 {dimension_numbers = #tpu.dot_dimension_numbers<[0], [0], [1], [1], [0, 1, 1, 1], [], []>} : vector<16x64xf32>, vector<16x64xf32>, vector<64x64xf32> -> vector<64x64xf32>
    %118 = arith.addf %115, %117 : vector<64x64xf32>
    %119 = vector.extract_strided_slice %71 {offsets = [0, 0], sizes = [16, 64], strides = [1, 1]} : vector<16x128xf32> to vector<16x64xf32>
    %cst_43 = arith.constant dense<0.000000e+00> : vector<64x64xf32>
    %120 = tpu.matmul %90, %119, %cst_43 {dimension_numbers = #tpu.dot_dimension_numbers<[0], [0], [1], [1], [0, 1, 1, 1], [], []>} : vector<16x64xf32>, vector<16x64xf32>, vector<64x64xf32> -> vector<64x64xf32>
    %121 = arith.addf %118, %120 : vector<64x64xf32>
    %c0_44 = arith.constant 0 : index
    %c0_45 = arith.constant 0 : index
    %c0_46 = arith.constant 0 : index
    %122 = vector.load %arg11[%c0_44, %c0_45, %c0_46] : memref<2x64x64xf32, #tpu.memory_space<vmem>>, vector<1x64x64xf32>
    %123 = vector.shape_cast %122 : vector<1x64x64xf32> to vector<64x64xf32>
    %124 = vector.shape_cast %121 : vector<64x64xf32> to vector<1x64x64xf32>
    tpu.vector_store %arg11[%c0_44, %c0_45, %c0_46], %124 {strides = array<i32>} : memref<2x64x64xf32, #tpu.memory_space<vmem>>, vector<1x64x64xf32>,
    %c1 = arith.constant 1 : index
    %c0_47 = arith.constant 0 : index
    %c0_48 = arith.constant 0 : index
    %125 = vector.load %arg11[%c1, %c0_47, %c0_48] : memref<2x64x64xf32, #tpu.memory_space<vmem>>, vector<1x64x64xf32>
    %126 = vector.shape_cast %125 : vector<1x64x64xf32> to vector<64x64xf32>
    %127 = vector.extract_strided_slice %67 {offsets = [0, 64], sizes = [16, 64], strides = [1, 1]} : vector<16x128xf32> to vector<16x64xf32>
    %128 = vector.extract_strided_slice %68 {offsets = [0, 64], sizes = [16, 64], strides = [1, 1]} : vector<16x128xf32> to vector<16x64xf32>
    %cst_49 = arith.constant dense<0.000000e+00> : vector<16x16xf32>
    %129 = tpu.matmul %127, %128, %cst_49 {dimension_numbers = #tpu.dot_dimension_numbers<[1], [1], [0], [0], [0, 0, 1, 0], [], []>} : vector<16x64xf32>, vector<16x64xf32>, vector<16x16xf32> -> vector<16x16xf32>
    %130 = arith.select %40, %129, %44 : vector<16x16xi1>, vector<16x16xf32>
    %131 = vector.extract_strided_slice %67 {offsets = [0, 64], sizes = [16, 64], strides = [1, 1]} : vector<16x128xf32> to vector<16x64xf32>
    %132 = vector.extract_strided_slice %69 {offsets = [0, 64], sizes = [16, 64], strides = [1, 1]} : vector<16x128xf32> to vector<16x64xf32>
    %cst_50 = arith.constant dense<0.000000e+00> : vector<16x16xf32>
    %133 = tpu.matmul %131, %132, %cst_50 {dimension_numbers = #tpu.dot_dimension_numbers<[1], [1], [0], [0], [0, 0, 1, 0], [], []>} : vector<16x64xf32>, vector<16x64xf32>, vector<16x16xf32> -> vector<16x16xf32>
    %134 = arith.select %40, %133, %44 : vector<16x16xi1>, vector<16x16xf32>
    %135 = vector.extract_strided_slice %65 {offsets = [0, 64], sizes = [16, 64], strides = [1, 1]} : vector<16x128xf32> to vector<16x64xf32>
    %136 = vector.extract_strided_slice %68 {offsets = [0, 64], sizes = [16, 64], strides = [1, 1]} : vector<16x128xf32> to vector<16x64xf32>
    %cst_51 = arith.constant dense<0.000000e+00> : vector<16x16xf32>
    %137 = tpu.matmul %135, %136, %cst_51 {dimension_numbers = #tpu.dot_dimension_numbers<[1], [1], [0], [0], [0, 0, 1, 0], [], []>} : vector<16x64xf32>, vector<16x64xf32>, vector<16x16xf32> -> vector<16x16xf32>
    %138 = arith.select %41, %137, %44 : vector<16x16xi1>, vector<16x16xf32>
    %139 = vector.extract_strided_slice %65 {offsets = [0, 64], sizes = [16, 64], strides = [1, 1]} : vector<16x128xf32> to vector<16x64xf32>
    %140 = vector.extract_strided_slice %69 {offsets = [0, 64], sizes = [16, 64], strides = [1, 1]} : vector<16x128xf32> to vector<16x64xf32>
    %cst_52 = arith.constant dense<0.000000e+00> : vector<16x16xf32>
    %141 = tpu.matmul %139, %140, %cst_52 {dimension_numbers = #tpu.dot_dimension_numbers<[1], [1], [0], [0], [0, 0, 1, 0], [], []>} : vector<16x64xf32>, vector<16x64xf32>, vector<16x16xf32> -> vector<16x16xf32>
    %142 = arith.select %41, %141, %44 : vector<16x16xi1>, vector<16x16xf32>
    %143 = vector.extract_strided_slice %29 {offsets = [0, 64], sizes = [16, 64], strides = [1, 1]} : vector<16x128xf32> to vector<16x64xf32>
    %144 = vector.extract_strided_slice %63 {offsets = [0, 64], sizes = [16, 64], strides = [1, 1]} : vector<16x128xf32> to vector<16x64xf32>
    %cst_53 = arith.constant dense<0.000000e+00> : vector<16x64xf32>
    %145 = tpu.matmul %144, %126, %cst_53 {dimension_numbers = #tpu.dot_dimension_numbers<[1], [1], [0], [0], [0, 0, 1, 0], [], []>} : vector<16x64xf32>, vector<64x64xf32>, vector<16x64xf32> -> vector<16x64xf32>
    %cst_54 = arith.constant dense<0.000000e+00> : vector<16x64xf32>
    %146 = tpu.matmul %134, %143, %cst_54 {dimension_numbers = #tpu.dot_dimension_numbers<[1], [0], [0], [1], [0, 0, 1, 1], [], []>} : vector<16x16xf32>, vector<16x64xf32>, vector<16x64xf32> -> vector<16x64xf32>
    %147 = arith.addf %145, %146 : vector<16x64xf32>
    %cst_55 = arith.constant dense<0.000000e+00> : vector<16x64xf32>
    %148 = tpu.matmul %130, %147, %cst_55 {dimension_numbers = #tpu.dot_dimension_numbers<[1], [0], [0], [1], [0, 0, 1, 1], [], []>} : vector<16x16xf32>, vector<16x64xf32>, vector<16x64xf32> -> vector<16x64xf32>
    %149 = arith.addf %147, %148 : vector<16x64xf32>
    %cst_56 = arith.constant dense<0.000000e+00> : vector<16x16xf32>
    %150 = tpu.matmul %130, %130, %cst_56 {dimension_numbers = #tpu.dot_dimension_numbers<[1], [0], [0], [1], [0, 0, 1, 1], [], []>} : vector<16x16xf32>, vector<16x16xf32>, vector<16x16xf32> -> vector<16x16xf32>
    %cst_57 = arith.constant dense<0.000000e+00> : vector<16x64xf32>
    %151 = tpu.matmul %150, %149, %cst_57 {dimension_numbers = #tpu.dot_dimension_numbers<[1], [0], [0], [1], [0, 0, 1, 1], [], []>} : vector<16x16xf32>, vector<16x64xf32>, vector<16x64xf32> -> vector<16x64xf32>
    %152 = arith.addf %149, %151 : vector<16x64xf32>
    %cst_58 = arith.constant dense<0.000000e+00> : vector<16x16xf32>
    %153 = tpu.matmul %150, %150, %cst_58 {dimension_numbers = #tpu.dot_dimension_numbers<[1], [0], [0], [1], [0, 0, 1, 1], [], []>} : vector<16x16xf32>, vector<16x16xf32>, vector<16x16xf32> -> vector<16x16xf32>
    %cst_59 = arith.constant dense<0.000000e+00> : vector<16x64xf32>
    %154 = tpu.matmul %153, %152, %cst_59 {dimension_numbers = #tpu.dot_dimension_numbers<[1], [0], [0], [1], [0, 0, 1, 1], [], []>} : vector<16x16xf32>, vector<16x64xf32>, vector<16x64xf32> -> vector<16x64xf32>
    %155 = arith.addf %152, %154 : vector<16x64xf32>
    %cst_60 = arith.constant dense<0.000000e+00> : vector<16x16xf32>
    %156 = tpu.matmul %153, %153, %cst_60 {dimension_numbers = #tpu.dot_dimension_numbers<[1], [0], [0], [1], [0, 0, 1, 1], [], []>} : vector<16x16xf32>, vector<16x16xf32>, vector<16x16xf32> -> vector<16x16xf32>
    %cst_61 = arith.constant dense<0.000000e+00> : vector<16x64xf32>
    %157 = tpu.matmul %156, %155, %cst_61 {dimension_numbers = #tpu.dot_dimension_numbers<[1], [0], [0], [1], [0, 0, 1, 1], [], []>} : vector<16x16xf32>, vector<16x64xf32>, vector<16x64xf32> -> vector<16x64xf32>
    %158 = arith.addf %155, %157 : vector<16x64xf32>
    %159 = vector.extract_strided_slice %62 {offsets = [0, 64], sizes = [16, 64], strides = [1, 1]} : vector<16x128xf32> to vector<16x64xf32>
    %cst_62 = arith.constant dense<0.000000e+00> : vector<16x64xf32>
    %160 = tpu.matmul %159, %126, %cst_62 {dimension_numbers = #tpu.dot_dimension_numbers<[1], [1], [0], [0], [0, 0, 1, 0], [], []>} : vector<16x64xf32>, vector<64x64xf32>, vector<16x64xf32> -> vector<16x64xf32>
    %cst_63 = arith.constant dense<0.000000e+00> : vector<16x64xf32>
    %161 = tpu.matmul %138, %158, %cst_63 {dimension_numbers = #tpu.dot_dimension_numbers<[1], [0], [0], [1], [0, 0, 1, 1], [], []>} : vector<16x16xf32>, vector<16x64xf32>, vector<16x64xf32> -> vector<16x64xf32>
    %162 = arith.addf %160, %161 : vector<16x64xf32>
    %cst_64 = arith.constant dense<0.000000e+00> : vector<16x64xf32>
    %163 = tpu.matmul %142, %143, %cst_64 {dimension_numbers = #tpu.dot_dimension_numbers<[1], [0], [0], [1], [0, 0, 1, 1], [], []>} : vector<16x16xf32>, vector<16x64xf32>, vector<16x64xf32> -> vector<16x64xf32>
    %164 = arith.addf %162, %163 : vector<16x64xf32>
    %c0_65 = arith.constant 0 : index
    %c64 = arith.constant 64 : index
    %165 = vector.load %arg9[%c0_65, %c64] : memref<16x128xf32, #tpu.memory_space<vmem>>, vector<16x64xf32>
    tpu.vector_store %arg9[%c0_65, %c64], %164 {strides = array<i32>} : memref<16x128xf32, #tpu.memory_space<vmem>>, vector<16x64xf32>,
    %166 = vector.extract_strided_slice %59 {offsets = [0, 64], sizes = [1, 64], strides = [1, 1]} : vector<1x128xf32> to vector<1x64xf32>
    %167 = vector.broadcast %166 : vector<1x64xf32> to vector<64x64xf32>
    %168 = arith.mulf %126, %167 : vector<64x64xf32>
    %169 = vector.extract_strided_slice %70 {offsets = [0, 64], sizes = [16, 64], strides = [1, 1]} : vector<16x128xf32> to vector<16x64xf32>
    %cst_66 = arith.constant dense<0.000000e+00> : vector<64x64xf32>
    %170 = tpu.matmul %158, %169, %cst_66 {dimension_numbers = #tpu.dot_dimension_numbers<[0], [0], [1], [1], [0, 1, 1, 1], [], []>} : vector<16x64xf32>, vector<16x64xf32>, vector<64x64xf32> -> vector<64x64xf32>
    %171 = arith.addf %168, %170 : vector<64x64xf32>
    %172 = vector.extract_strided_slice %71 {offsets = [0, 64], sizes = [16, 64], strides = [1, 1]} : vector<16x128xf32> to vector<16x64xf32>
    %cst_67 = arith.constant dense<0.000000e+00> : vector<64x64xf32>
    %173 = tpu.matmul %143, %172, %cst_67 {dimension_numbers = #tpu.dot_dimension_numbers<[0], [0], [1], [1], [0, 1, 1, 1], [], []>} : vector<16x64xf32>, vector<16x64xf32>, vector<64x64xf32> -> vector<64x64xf32>
    %174 = arith.addf %171, %173 : vector<64x64xf32>
    %c1_68 = arith.constant 1 : index
    %c0_69 = arith.constant 0 : index
    %c0_70 = arith.constant 0 : index
    %175 = vector.load %arg11[%c1_68, %c0_69, %c0_70] : memref<2x64x64xf32, #tpu.memory_space<vmem>>, vector<1x64x64xf32>
    %176 = vector.shape_cast %175 : vector<1x64x64xf32> to vector<64x64xf32>
    %177 = vector.shape_cast %174 : vector<64x64xf32> to vector<1x64x64xf32>
    tpu.vector_store %arg11[%c1_68, %c0_69, %c0_70], %177 {strides = array<i32>} : memref<2x64x64xf32, #tpu.memory_space<vmem>>, vector<1x64x64xf32>,
    %c2_i32 = arith.constant 2 : i32
    %178 = arith.cmpi eq, %arg1, %c2_i32 : i32
    %179 = arith.extui %178 : i1 to i32
    %c0_i32_71 = arith.constant 0 : i32
    %180 = arith.cmpi ne, %179, %c0_i32_71 : i32
    scf.if %180 {
      %c0_72 = arith.constant 0 : index
      %c0_73 = arith.constant 0 : index
      %c0_74 = arith.constant 0 : index
      %181 = vector.load %arg11[%c0_72, %c0_73, %c0_74] : memref<2x64x64xf32, #tpu.memory_space<vmem>>, vector<2x64x64xf32>
      %c0_75 = arith.constant 0 : index
      %c0_76 = arith.constant 0 : index
      %c0_77 = arith.constant 0 : index
      %182 = vector.load %arg10[%c0_75, %c0_76, %c0_77] : memref<2x64x64xf32, #tpu.memory_space<vmem>>, vector<2x64x64xf32>
      tpu.vector_store %arg10[%c0_75, %c0_76, %c0_77], %181 {strides = array<i32>} : memref<2x64x64xf32, #tpu.memory_space<vmem>>, vector<2x64x64xf32>,
    } else {
    }
    return
  }
  func.func @transform_0(%arg0: i32, %arg1: i32) -> (i32, i32) {
    %c0_i32 = arith.constant 0 : i32
    return %arg1, %arg0 : i32, i32
  }
  func.func @transform_1(%arg0: i32, %arg1: i32) -> (i32, i32) {
    %c0_i32 = arith.constant 0 : i32
    return %arg1, %arg0 : i32, i32
  }
  func.func @transform_2(%arg0: i32, %arg1: i32) -> (i32, i32) {
    %c0_i32 = arith.constant 0 : i32
    return %arg1, %arg0 : i32, i32
  }
  func.func @transform_3(%arg0: i32, %arg1: i32) -> (i32, i32) {
    %c0_i32 = arith.constant 0 : i32
    return %arg1, %arg0 : i32, i32
  }
  func.func @transform_4(%arg0: i32, %arg1: i32) -> (i32, i32) {
    %c0_i32 = arith.constant 0 : i32
    return %arg1, %arg0 : i32, i32
  }
  func.func @transform_5(%arg0: i32, %arg1: i32) -> (i32, i32) {
    %c0_i32 = arith.constant 0 : i32
    return %arg1, %arg0 : i32, i32
  }
  func.func @transform_6(%arg0: i32, %arg1: i32) -> (i32, i32, i32) {
    %c0_i32 = arith.constant 0 : i32
    %c0_i32_0 = arith.constant 0 : i32
    %c0_i32_1 = arith.constant 0 : i32
    return %arg0, %c0_i32, %c0_i32_0 : i32, i32, i32
  }
  func.func @transform_7(%arg0: i32, %arg1: i32) -> (i32, i32) {
    %c0_i32 = arith.constant 0 : i32
    return %arg1, %arg0 : i32, i32
  }
  func.func @transform_8(%arg0: i32, %arg1: i32) -> (i32, i32, i32) {
    %c0_i32 = arith.constant 0 : i32
    %c0_i32_0 = arith.constant 0 : i32
    %c0_i32_1 = arith.constant 0 : i32
    return %arg0, %c0_i32, %c0_i32_0 : i32, i32, i32
  }
}

</mosaic_0001>

<bundles_post_ra>
// kernel: tpu_custom_call.1
= control target key start
LH: loop header
LB: loop body
LE: loop exit
PB: predicated region body
PF: predicated region fallthrough
CT: control target
= control target key end

     0   :  { %s8995_s0 = inlined_call_operand.vmem [shape: f32[40,256], index: 0, kind: input, shape index: {}]   ;;  %s8996_s1 = inlined_call_operand.vmem [shape: f32[40,256], index: 1, kind: input, shape index: {}]   ;;  %s8997_s2 = inlined_call_operand.vmem [shape: f32[40,256], index: 2, kind: input, shape index: {}]   ;;  %s8998_s3 = inlined_call_operand.vmem [shape: f32[40,256], index: 3, kind: input, shape index: {}]   ;;  %s8999_s4 = inlined_call_operand.vmem [shape: f32[40,256], index: 4, kind: input, shape index: {}]   ;;  %s9000_s5 = inlined_call_operand.vmem [shape: f32[40,256], index: 5, kind: input, shape index: {}]   ;;  %s9001_s6 = inlined_call_operand.hbm [shape: f32[4,64,64], index: 6, kind: input, shape index: {}, may-alias: {6,8}]   ;;  %s9002_s7 = inlined_call_operand.hbm [shape: f32[40,256], index: 7, kind: output, shape index: {0}]   ;;  %s9003_s8 = inlined_call_operand.hbm [shape: f32[4,64,64], index: 8, kind: output, shape index: {1}, may-alias: {6,8}]  }
   0x1   :  { %9016 = sst [smem:[#allocation29_spill]] %s8995_s0 }
   0x2   :  { %9017 = sst [smem:[#allocation30_spill]] %s8996_s1 }
   0x3   :  { %9018 = sst [smem:[#allocation31_spill]] %s9002_s7 }
   0x4   :  { %9019 = sst [smem:[#allocation32_spill]] %s9003_s8 }
   0x5   :  { %14 = vsyncpa [#allocation10], 0 }
   0x6   :  { %16 = vsyncpa [#allocation10 + $0x1], 0 }
   0x7   :  { %17 = vsyncpa [#allocation11], 0 }
   0x8   :  { %19 = vsyncpa [#allocation11 + $0x1], 0 }
   0x9   :  { %20 = vsyncpa [#allocation14], 0 }
   0xa   :  { %22 = vsyncpa [#allocation14 + $0x1], 0  ;;  %s7755_s27 = smov 0   ;;  %s7757_s28 = smov 0  }
   0xb   :  { %s7759_s29 = smov 0   ;;  %s7761_s30 = smov 0  }
   0xc   :  { %s7763_s9 = smov 0   ;;  %s7765_s10 = smov 0  }
   0xd   :  { %s7767_s11 = smov 0   ;;  %s7769_s12 = smov 0  }
   0xe   :  { %s7771_s13 = smov 0   ;;  %s7773_s14 = smov 0  }
   0xf   :  { %s7775_s15 = smov 0  }
  0x10 LB: > { %9020 = sst [smem:[#allocation18_spill]] %s7464_s27  ;;  %s5453_s16 = sadd.s32 4294967295, %s7504_s15   ;;  %s7504_s15 = sphi %s7775_s15, %s28_s15   ;;  %s7500_s14 = sphi %s7773_s14, %s9086_s14   ;;  %s7496_s13 = sphi %s7771_s13, %s9085_s13   ;;  %s7492_s12 = sphi %s7769_s12, %s9084_s12   ;;  %s7488_s11 = sphi %s7767_s11, %s9083_s11   ;;  %s7484_s10 = sphi %s7765_s10, %s9082_s10   ;;  %s7480_s9 = sphi %s7763_s9, %s9081_s9   ;;  %s7476_s30 = sphi %s7761_s30, %s9080_s30   ;;  %s7472_s29 = sphi %s7759_s29, %s9079_s29   ;;  %s7468_s28 = sphi %s7757_s28, %s9078_s28   ;;  %s7464_s27 = sphi %s7755_s27, %s9077_s27  }
  0x11   : > { %9021 = sst [smem:[#allocation19_spill]] %s7468_s28  ;;  %s5454_s17 = sadd.s32 4294967294, %s7504_s15  }
  0x12   : > { %9022 = sst [smem:[#allocation20_spill]] %s7492_s12  ;;  %s37_s18 = sadd.s32 1, %s7496_s13 }
  0x13   : > { %s40_s19 = sadd.s32 1, %s7500_s14  ;;  %p38_p0 = scmp.ge.s32.totalorder %s37_s18, 3 }
  0x14   : > { %s49_s20 = sadd.s32 1, %s7484_s10  ;;  %p56_p1 = scmp.ne.s32.totalorder %s7484_s10, %s7480_s9 }
  0x15   : > { %p57_p2 = scmp.eq.s32.totalorder %s7504_s15, 0  ;;  %s9088_s18 = smov (%p38_p0, %s37_s18), 0 }
  0x16   : > { %9023 = sst [smem:[#allocation21_spill]] %s9088_s18  ;;  %s9090_s19 = smov (!%p38_p0, %s40_s19), %s7500_s14 }
  0x17   : > { %s44_s21 = ssub.s32 %s7496_s13, %s9088_s18  ;;  %p7826_p3 = por %p57_p2, %p56_p1 }
  0x18   : > { %p42_p4 = scmp.ge.s32.totalorder %s9090_s19, 2  ;;  %s215_s23 = sadd.s32 1, %s7476_s30 }
  0x19   : > { %p222_p5 = scmp.ne.s32.totalorder %s7476_s30, %s7472_s29  ;;  %p228_p6 = scmp.ne.s32.totalorder %s7472_s29, %s7468_s28 }
  0x1a   : > { %s9092_s19 = smov (%p42_p4, %s9090_s19), 0  ;;  %p229_p8 = scmp.eq.s32.totalorder %s5453_s16, 0 }
  0x1b   : > { %9025 = sst [smem:[#allocation22_spill]] %s9092_s19  ;;  %p7840_p7 = por %p222_p5, %p57_p2 }
  0x1c   : > { %s45_s25 = ssub.s32 %s7500_s14, %s9092_s19  ;;  %p254_p9 = scmp.eq.s32.totalorder %s5453_s16, 5 }
  0x1d   : > { %s46_s26 = sor.u32 %s45_s25, %s44_s21  ;;  %p213_p10 = scmp.eq.s32.totalorder %s45_s25, 0 }
  0x1e   : > { %p47_p11 = scmp.eq.s32.totalorder %s46_s26, 0  ;;  %p7849_p12 = por %p229_p8, %p228_p6 }
  0x1f   : > { %s7854_s8 = scalar_select %p213_p10, %s7476_s30, %s215_s23  }
  0x20   : > { %s7857_s7 = scalar_select %p47_p11, %s7484_s10, %s49_s20  }
  0x21   : > { %9028 = sst [smem:[#allocation23_spill]] %s7854_s8  ;;  %p7862_p13 = por %p254_p9, %p56_p1 }
  0x22   : > { %9029 = sst [smem:[#allocation24_spill]] %s7857_s7  ;;  %p259_p0 = scmp.ne.s32.totalorder %s7480_s9, %s7464_s27 }
  0x23   : > { %s9030_s12 = scalar_select %p7862_p13, 1, 0 }
  0x24   : > { %p260_p2 = scmp.eq.s32.totalorder %s5454_s17, 5  ;;  %p7871_p4 = por %p254_p9, %p222_p5 }
  0x25   : > { %9031 = sst [smem:[#allocation25_spill]] %s9030_s12  ;;  %p5456_p1 = scmp.ge.s32.totalorder %s7504_s15, 6 }
  0x26   : > { %s9032_s16 = scalar_select %p7871_p4, 1, 0 }
  0x27   : > { %p7875_p8 = por %p260_p2, %p259_p0  ;;  %p7882_p10 = por %p260_p2, %p228_p6 }
  0x28   : > { %9033 = sst [smem:[#allocation26_spill]] %s9032_s16  ;;  %302 = sbr.rel (%p5456_p1) target bundleno = 409 (0x199), region = 16 }
  0x29   : > { %s9034_s21 = scalar_select %p7875_p8, 1, 0 }
  0x2a   : > { %s9036_s20 = scalar_select %p7882_p10, 1, 0 }
  0x2b   : > { %9035 = sst [smem:[#allocation27_spill]] %s9034_s21 }
  0x2c   : > { %9037 = sst [smem:[#allocation28_spill]] %s9036_s20 }
  0x2f   : > { %305 = sbr.rel (!%p7826_p3) target bundleno = 103 (0x67), region = 20  ;;  %s307_s17 = sand.u32 (%p7826_p3), 1, %s7484_s10  }
  0x30   : > { %s5458_s23 = sshll.u32 (%p7826_p3), %s7496_s13, 1  ;;  %s5457_s25 = sshll.u32 (%p7826_p3), %s307_s17, 4 }
  0x31   : > { %s311_s26 = ssub.s32 (%p7826_p3), 5, %s5458_s23  ;;  %s5740_s19 = sshll.u32 (%p7826_p3), %s7496_s13, 2 }
  0x32   : > { %p312_p5 = scmp.lt.s32.totalorder (%p7826_p3), %s311_s26, 2  ;;  %s317_s7 = sadd.s32 (%p7826_p3), %s7500_s14, %s5740_s19 }
  0x33   : > { %s5462_s20 = sshll.u32 (%p7826_p3), %s317_s7, 3  ;;  %s9038_s0 = sld [smem:[#allocation29_spill]] (%p7826_p3) }
  0x34   : > { %s7901_s16 = scalar_lea.vmem (%p7826_p3), [#allocation3], %s5457_s25  }
  0x36   : > { %s9094_s26 = smov (!%p312_p5, %s311_s26), 2 }
  0x37   : > { %s5459_s8 = sshll.u32 %s9094_s26, 7 }
  0x38   : > { %p5463_p6 = scmp.eq.s32.totalorder %s5459_s8, 0 }
  0x39   : > { %s7899_s27 = scalar_lea.vmem %s9038_s0, %s5462_s20   ;;  %s7904_s17 = sshrl.u32 (!%p5463_p6), %s9094_s26, 1 }
  0x3a   : > { %322 = sbr.rel (%p5463_p6) target bundleno = 103 (0x67), region = 24  ;;  %p5464_p9 = scmp.le.s32.totalorder (!%p5463_p6), %s7904_s17, 0 }
  0x41   : > { %5210 = sbr.rel (%p5464_p9) target bundleno = 82 (0x52), region = 521  ;;  %s7506_s19 = smov (!%p5464_p9), %s7901_s16  }
  0x42   : > { %s7510_s23 = smov (!%p5464_p9), %s7899_s27   ;;  %s7514_s7 = smov (!%p5464_p9), 0  }
  0x43   : > { %s7518_s12 = smov (!%p5464_p9), 0  }
  0x48 LB: >> { %v386_v0 = vld [vmem:[%s7512_s23] sm:$0xff]  ;;  %v388_v1 = vld [vmem:[%s7512_s23 + $0x10] sm:$0xff]  ;;  %s390_s8 = sadd.s32 1, %s7516_s7  ;;  %s380_s12 = sadd.s32 1, %s7520_s12   ;;  %s7520_s12 = sphi %s7518_s12, %s380_s12   ;;  %s7516_s7 = sphi %s7514_s7, %s7515_s7   ;;  %s7512_s23 = sphi %s7510_s23, %s395_s23   ;;  %s7508_s19 = sphi %s7506_s19, %s396_s19  }
  0x49   : >> { %387 = vst [vmem:[%s7508_s19] sm:$0xff] %v386_v0  ;;  %389 = vst [vmem:[%s7508_s19 + $0x8] sm:$0xff] %v388_v1  ;;  %p391_p11 = scmp.ge.s32.totalorder %s390_s8, %s7904_s17  ;;  %p379_p0 = scmp.ge.s32.totalorder %s380_s12, %s7904_s17 }
  0x4b   : >> { %s9096_s8 = smov (%p391_p11, %s390_s8), 0  ;;  %382 = sbr.rel (!%p379_p0) target bundleno = 72 (0x48), region = 527 }
  0x4c   : >> { %s5465_s28 = sshll.u32 %s9096_s8, 5  ;;  %s5466_s21 = sshll.u32 %s9096_s8, 4 }
  0x4d   : >> { %s395_s23 = scalar_lea.vmem %s7899_s27, %s5465_s28   ;;  %s396_s19 = scalar_lea.vmem %s7901_s16, %s5466_s21 [#allocation3]  }
  0x4e   : >> { %s7515_s7 = smov %s9096_s8  }
  0x52 PF: > { %s7914_s20 = sand.u32 1, %s9094_s26   ;;  %s5741_s25 = sshll.u32 %s7904_s17, 5 }
  0x53   : > { %s7918_s7 = scalar_lea.vmem %s7899_s27, %s5741_s25   ;;  %s5742_s28 = sshll.u32 %s7904_s17, 4 }
  0x54   : > { %s403_s21 = scalar_lea.vmem %s7901_s16, %s5742_s28 [#allocation3]   ;;  %p5470_p2 = scmp.le.s32.totalorder %s7914_s20, 0 }
  0x55   : > { %s7522_s19 = smov (!%p5470_p2), %s403_s21   ;;  %s7526_s12 = smov (!%p5470_p2), %s7918_s7  }
  0x56   : > { %5224 = sbr.rel (%p5470_p2) target bundleno = 103 (0x67), region = 532  ;;  %s7530_s23 = smov (!%p5470_p2), 0  }
  0x57   : > { %s7534_s8 = smov (!%p5470_p2), 0  }
  0x5d LB: >> { %v413_v2 = vld [vmem:[%s7528_s12] sm:$0xff]  ;;  %s415_s27 = sadd.s32 1, %s7532_s23  ;;  %s407_s8 = sadd.s32 1, %s7536_s8   ;;  %s7536_s8 = sphi %s7534_s8, %s407_s8   ;;  %s7532_s23 = sphi %s7530_s23, %s7531_s23   ;;  %s7528_s12 = sphi %s7526_s12, %s420_s12   ;;  %s7524_s19 = sphi %s7522_s19, %s421_s19  }
  0x5e   : >> { %414 = vst [vmem:[%s7524_s19] sm:$0xff] %v413_v2  ;;  %p416_p1 = scmp.ge.s32.totalorder %s415_s27, %s7914_s20  ;;  %p406_p5 = scmp.ge.s32.totalorder %s407_s8, %s7914_s20 }
  0x60   : >> { %s9098_s27 = smov (%p416_p1, %s415_s27), 0  ;;  %409 = sbr.rel (!%p406_p5) target bundleno = 93 (0x5d), region = 538 }
  0x61   : >> { %s5471_s16 = sshll.u32 %s9098_s27, 4  ;;  %s5472_s26 = sshll.u32 %s9098_s27, 3 }
  0x62   : >> { %s420_s12 = scalar_lea.vmem %s7918_s7, %s5471_s16   ;;  %s421_s19 = scalar_lea.vmem %s403_s21, %s5472_s26 [#allocation3]  }
  0x63   : >> { %s7531_s23 = smov %s9098_s27  }
  0x67 PF: > { %427 = sbr.rel (!%p7826_p3) target bundleno = 159 (0x9f), region = 72  ;;  %s429_s17 = sand.u32 (%p7826_p3), 1, %s7484_s10  }
  0x68   : > { %s5474_s25 = sshll.u32 (%p7826_p3), %s7496_s13, 1  ;;  %s5473_s28 = sshll.u32 (%p7826_p3), %s429_s17, 4 }
  0x69   : > { %s433_s23 = ssub.s32 (%p7826_p3), 5, %s5474_s25  ;;  %s5743_s19 = sshll.u32 (%p7826_p3), %s7496_s13, 2 }
  0x6a   : > { %p434_p6 = scmp.lt.s32.totalorder (%p7826_p3), %s433_s23, 2  ;;  %s439_s12 = sadd.s32 (%p7826_p3), %s7500_s14, %s5743_s19 }
  0x6b   : > { %s5478_s7 = sshll.u32 (%p7826_p3), %s439_s12, 3  ;;  %s9039_s1 = sld [smem:[#allocation30_spill]] (%p7826_p3) }
  0x6c   : > { %s7941_s16 = scalar_lea.vmem (%p7826_p3), [#allocation4], %s5473_s28  }
  0x6e   : > { %s9100_s23 = smov (!%p434_p6, %s433_s23), 2 }
  0x6f   : > { %s5475_s20 = sshll.u32 %s9100_s23, 7 }
  0x70   : > { %p5479_p9 = scmp.eq.s32.totalorder %s5475_s20, 0 }
  0x71   : > { %s7939_s27 = scalar_lea.vmem %s9039_s1, %s5478_s7   ;;  %s7944_s26 = sshrl.u32 (!%p5479_p9), %s9100_s23, 1 }
  0x72   : > { %444 = sbr.rel (%p5479_p9) target bundleno = 159 (0x9f), region = 76  ;;  %p5480_p11 = scmp.le.s32.totalorder (!%p5479_p9), %s7944_s26, 0 }
  0x79   : > { %5238 = sbr.rel (%p5480_p11) target bundleno = 138 (0x8a), region = 543  ;;  %s7538_s17 = smov (!%p5480_p11), %s7941_s16  }
  0x7a   : > { %s7542_s25 = smov (!%p5480_p11), %s7939_s27   ;;  %s7546_s19 = smov (!%p5480_p11), 0  }
  0x7b   : > { %s7550_s12 = smov (!%p5480_p11), 0  }
  0x80 LB: >> { %v508_v3 = vld [vmem:[%s7544_s25] sm:$0xff]  ;;  %v510_v4 = vld [vmem:[%s7544_s25 + $0x10] sm:$0xff]  ;;  %s512_s28 = sadd.s32 1, %s7548_s19  ;;  %s502_s12 = sadd.s32 1, %s7552_s12   ;;  %s7552_s12 = sphi %s7550_s12, %s502_s12   ;;  %s7548_s19 = sphi %s7546_s19, %s7547_s19   ;;  %s7544_s25 = sphi %s7542_s25, %s517_s25   ;;  %s7540_s17 = sphi %s7538_s17, %s518_s17  }
  0x81   : >> { %509 = vst [vmem:[%s7540_s17] sm:$0xff] %v508_v3  ;;  %511 = vst [vmem:[%s7540_s17 + $0x8] sm:$0xff] %v510_v4  ;;  %p513_p0 = scmp.ge.s32.totalorder %s512_s28, %s7944_s26  ;;  %p501_p2 = scmp.ge.s32.totalorder %s502_s12, %s7944_s26 }
  0x83   : >> { %s9102_s28 = smov (%p513_p0, %s512_s28), 0  ;;  %504 = sbr.rel (!%p501_p2) target bundleno = 128 (0x80), region = 549 }
  0x84   : >> { %s5481_s20 = sshll.u32 %s9102_s28, 5  ;;  %s5482_s7 = sshll.u32 %s9102_s28, 4 }
  0x85   : >> { %s517_s25 = scalar_lea.vmem %s7939_s27, %s5481_s20   ;;  %s518_s17 = scalar_lea.vmem %s7941_s16, %s5482_s7 [#allocation4]  }
  0x86   : >> { %s7547_s19 = smov %s9102_s28  }
  0x8a PF: > { %s7954_s21 = sand.u32 1, %s9100_s23   ;;  %s5744_s8 = sshll.u32 %s7944_s26, 5 }
  0x8b   : > { %s7958_s19 = scalar_lea.vmem %s7939_s27, %s5744_s8   ;;  %s5745_s20 = sshll.u32 %s7944_s26, 4 }
  0x8c   : > { %s525_s7 = scalar_lea.vmem %s7941_s16, %s5745_s20 [#allocation4]   ;;  %p5486_p1 = scmp.le.s32.totalorder %s7954_s21, 0 }
  0x8d   : > { %s7554_s17 = smov (!%p5486_p1), %s525_s7   ;;  %s7558_s25 = smov (!%p5486_p1), %s7958_s19  }
  0x8e   : > { %5252 = sbr.rel (%p5486_p1) target bundleno = 159 (0x9f), region = 554  ;;  %s7562_s12 = smov (!%p5486_p1), 0  }
  0x8f   : > { %s7566_s28 = smov (!%p5486_p1), 0  }
  0x95 LB: >> { %v535_v5 = vld [vmem:[%s7560_s25] sm:$0xff]  ;;  %s537_s23 = sadd.s32 1, %s7564_s12  ;;  %s529_s28 = sadd.s32 1, %s7568_s28   ;;  %s7568_s28 = sphi %s7566_s28, %s529_s28   ;;  %s7564_s12 = sphi %s7562_s12, %s7563_s12   ;;  %s7560_s25 = sphi %s7558_s25, %s542_s25   ;;  %s7556_s17 = sphi %s7554_s17, %s543_s17  }
  0x96   : >> { %536 = vst [vmem:[%s7556_s17] sm:$0xff] %v535_v5  ;;  %p538_p5 = scmp.ge.s32.totalorder %s537_s23, %s7954_s21  ;;  %p528_p6 = scmp.ge.s32.totalorder %s529_s28, %s7954_s21 }
  0x98   : >> { %s9104_s23 = smov (%p538_p5, %s537_s23), 0  ;;  %531 = sbr.rel (!%p528_p6) target bundleno = 149 (0x95), region = 560 }
  0x99   : >> { %s5487_s27 = sshll.u32 %s9104_s23, 4  ;;  %s5488_s16 = sshll.u32 %s9104_s23, 3 }
  0x9a   : >> { %s542_s25 = scalar_lea.vmem %s7958_s19, %s5487_s27   ;;  %s543_s17 = scalar_lea.vmem %s525_s7, %s5488_s16 [#allocation4]  }
  0x9b   : >> { %s7563_s12 = smov %s9104_s23  }
  0x9f PF: > { %549 = sbr.rel (!%p7826_p3) target bundleno = 215 (0xd7), region = 124  ;;  %s551_s26 = sand.u32 (%p7826_p3), 1, %s7484_s10  }
  0xa0   : > { %s5490_s8 = sshll.u32 (%p7826_p3), %s7496_s13, 1  ;;  %s5489_s20 = sshll.u32 (%p7826_p3), %s551_s26, 4 }
  0xa1   : > { %s555_s12 = ssub.s32 (%p7826_p3), 5, %s5490_s8  ;;  %s5746_s17 = sshll.u32 (%p7826_p3), %s7496_s13, 2 }
  0xa2   : > { %p556_p9 = scmp.lt.s32.totalorder (%p7826_p3), %s555_s12, 2  ;;  %s561_s25 = sadd.s32 (%p7826_p3), %s7500_s14, %s5746_s17 }
  0xa3   : > { %s5494_s19 = sshll.u32 (%p7826_p3), %s561_s25, 3  ;;  %s7981_s27 = scalar_lea.vmem (%p7826_p3), [#allocation5], %s5489_s20  }
  0xa4   : > { %s7979_s23 = scalar_lea.vmem (%p7826_p3), %s8997_s2, %s5494_s19  }
  0xa6   : > { %s9106_s12 = smov (!%p556_p9, %s555_s12), 2 }
  0xa7   : > { %s5491_s21 = sshll.u32 %s9106_s12, 7 }
  0xa8   : > { %p5495_p11 = scmp.eq.s32.totalorder %s5491_s21, 0 }
  0xa9   : > { %s7984_s16 = sshrl.u32 (!%p5495_p11), %s9106_s12, 1 }
  0xaa   : > { %566 = sbr.rel (%p5495_p11) target bundleno = 215 (0xd7), region = 128  ;;  %p5496_p0 = scmp.le.s32.totalorder (!%p5495_p11), %s7984_s16, 0 }
  0xb1   : > { %5266 = sbr.rel (%p5496_p0) target bundleno = 194 (0xc2), region = 565  ;;  %s7570_s26 = smov (!%p5496_p0), %s7981_s27  }
  0xb2   : > { %s7574_s8 = smov (!%p5496_p0), %s7979_s23   ;;  %s7578_s17 = smov (!%p5496_p0), 0  }
  0xb3   : > { %s7582_s25 = smov (!%p5496_p0), 0  }
  0xb8 LB: >> { %v630_v6 = vld [vmem:[%s7576_s8] sm:$0xff]  ;;  %v632_v7 = vld [vmem:[%s7576_s8 + $0x10] sm:$0xff]  ;;  %s634_s20 = sadd.s32 1, %s7580_s17  ;;  %s624_s25 = sadd.s32 1, %s7584_s25   ;;  %s7584_s25 = sphi %s7582_s25, %s624_s25   ;;  %s7580_s17 = sphi %s7578_s17, %s7579_s17   ;;  %s7576_s8 = sphi %s7574_s8, %s639_s8   ;;  %s7572_s26 = sphi %s7570_s26, %s640_s26  }
  0xb9   : >> { %631 = vst [vmem:[%s7572_s26] sm:$0xff] %v630_v6  ;;  %633 = vst [vmem:[%s7572_s26 + $0x8] sm:$0xff] %v632_v7  ;;  %p635_p2 = scmp.ge.s32.totalorder %s634_s20, %s7984_s16  ;;  %p623_p1 = scmp.ge.s32.totalorder %s624_s25, %s7984_s16 }
  0xbb   : >> { %s9108_s20 = smov (%p635_p2, %s634_s20), 0  ;;  %626 = sbr.rel (!%p623_p1) target bundleno = 184 (0xb8), region = 571 }
  0xbc   : >> { %s5497_s21 = sshll.u32 %s9108_s20, 5  ;;  %s5498_s19 = sshll.u32 %s9108_s20, 4 }
  0xbd   : >> { %s639_s8 = scalar_lea.vmem %s7979_s23, %s5497_s21   ;;  %s640_s26 = scalar_lea.vmem %s7981_s27, %s5498_s19 [#allocation5]  }
  0xbe   : >> { %s7579_s17 = smov %s9108_s20  }
  0xc2 PF: > { %s7994_s7 = sand.u32 1, %s9106_s12   ;;  %s5747_s28 = sshll.u32 %s7984_s16, 5 }
  0xc3   : > { %s7998_s17 = scalar_lea.vmem %s7979_s23, %s5747_s28   ;;  %s5748_s21 = sshll.u32 %s7984_s16, 4 }
  0xc4   : > { %s647_s19 = scalar_lea.vmem %s7981_s27, %s5748_s21 [#allocation5]   ;;  %p5502_p5 = scmp.le.s32.totalorder %s7994_s7, 0 }
  0xc5   : > { %s7586_s26 = smov (!%p5502_p5), %s647_s19   ;;  %s7590_s8 = smov (!%p5502_p5), %s7998_s17  }
  0xc6   : > { %5280 = sbr.rel (%p5502_p5) target bundleno = 215 (0xd7), region = 576  ;;  %s7594_s25 = smov (!%p5502_p5), 0  }
  0xc7   : > { %s7598_s20 = smov (!%p5502_p5), 0  }
  0xcd LB: >> { %v657_v8 = vld [vmem:[%s7592_s8] sm:$0xff]  ;;  %s659_s12 = sadd.s32 1, %s7596_s25  ;;  %s651_s20 = sadd.s32 1, %s7600_s20   ;;  %s7600_s20 = sphi %s7598_s20, %s651_s20   ;;  %s7596_s25 = sphi %s7594_s25, %s7595_s25   ;;  %s7592_s8 = sphi %s7590_s8, %s664_s8   ;;  %s7588_s26 = sphi %s7586_s26, %s665_s26  }
  0xce   : >> { %658 = vst [vmem:[%s7588_s26] sm:$0xff] %v657_v8  ;;  %p660_p6 = scmp.ge.s32.totalorder %s659_s12, %s7994_s7  ;;  %p650_p9 = scmp.ge.s32.totalorder %s651_s20, %s7994_s7 }
  0xd0   : >> { %s9110_s12 = smov (%p660_p6, %s659_s12), 0  ;;  %653 = sbr.rel (!%p650_p9) target bundleno = 205 (0xcd), region = 582 }
  0xd1   : >> { %s5503_s23 = sshll.u32 %s9110_s12, 4  ;;  %s5504_s27 = sshll.u32 %s9110_s12, 3 }
  0xd2   : >> { %s664_s8 = scalar_lea.vmem %s7998_s17, %s5503_s23   ;;  %s665_s26 = scalar_lea.vmem %s647_s19, %s5504_s27 [#allocation5]  }
  0xd3   : >> { %s7595_s25 = smov %s9110_s12  }
  0xd7 PF: > { %671 = sbr.rel (!%p7826_p3) target bundleno = 271 (0x10f), region = 176  ;;  %s673_s16 = sand.u32 (%p7826_p3), 1, %s7484_s10  }
  0xd8   : > { %s5506_s28 = sshll.u32 (%p7826_p3), %s7496_s13, 1  ;;  %s5505_s21 = sshll.u32 (%p7826_p3), %s673_s16, 4 }
  0xd9   : > { %s677_s25 = ssub.s32 (%p7826_p3), 5, %s5506_s28  ;;  %s5749_s26 = sshll.u32 (%p7826_p3), %s7496_s13, 2 }
  0xda   : > { %p678_p11 = scmp.lt.s32.totalorder (%p7826_p3), %s677_s25, 2  ;;  %s683_s8 = sadd.s32 (%p7826_p3), %s7500_s14, %s5749_s26 }
  0xdb   : > { %s5510_s17 = sshll.u32 (%p7826_p3), %s683_s8, 3  ;;  %s8021_s23 = scalar_lea.vmem (%p7826_p3), [#allocation6], %s5505_s21  }
  0xdc   : > { %s8019_s12 = scalar_lea.vmem (%p7826_p3), %s8998_s3, %s5510_s17  }
  0xde   : > { %s9112_s25 = smov (!%p678_p11, %s677_s25), 2 }
  0xdf   : > { %s5507_s7 = sshll.u32 %s9112_s25, 7 }
  0xe0   : > { %p5511_p0 = scmp.eq.s32.totalorder %s5507_s7, 0 }
  0xe1   : > { %s8024_s27 = sshrl.u32 (!%p5511_p0), %s9112_s25, 1 }
  0xe2   : > { %688 = sbr.rel (%p5511_p0) target bundleno = 271 (0x10f), region = 180  ;;  %p5512_p2 = scmp.le.s32.totalorder (!%p5511_p0), %s8024_s27, 0 }
  0xe9   : > { %5294 = sbr.rel (%p5512_p2) target bundleno = 250 (0xfa), region = 587  ;;  %s7602_s16 = smov (!%p5512_p2), %s8021_s23  }
  0xea   : > { %s7606_s28 = smov (!%p5512_p2), %s8019_s12   ;;  %s7610_s26 = smov (!%p5512_p2), 0  }
  0xeb   : > { %s7614_s8 = smov (!%p5512_p2), 0  }
  0xf0 LB: >> { %v752_v9 = vld [vmem:[%s7608_s28] sm:$0xff]  ;;  %v754_v10 = vld [vmem:[%s7608_s28 + $0x10] sm:$0xff]  ;;  %s756_s21 = sadd.s32 1, %s7612_s26  ;;  %s746_s8 = sadd.s32 1, %s7616_s8   ;;  %s7616_s8 = sphi %s7614_s8, %s746_s8   ;;  %s7612_s26 = sphi %s7610_s26, %s7611_s26   ;;  %s7608_s28 = sphi %s7606_s28, %s761_s28   ;;  %s7604_s16 = sphi %s7602_s16, %s762_s16  }
  0xf1   : >> { %753 = vst [vmem:[%s7604_s16] sm:$0xff] %v752_v9  ;;  %755 = vst [vmem:[%s7604_s16 + $0x8] sm:$0xff] %v754_v10  ;;  %p757_p1 = scmp.ge.s32.totalorder %s756_s21, %s8024_s27  ;;  %p745_p5 = scmp.ge.s32.totalorder %s746_s8, %s8024_s27 }
  0xf3   : >> { %s9114_s21 = smov (%p757_p1, %s756_s21), 0  ;;  %748 = sbr.rel (!%p745_p5) target bundleno = 240 (0xf0), region = 593 }
  0xf4   : >> { %s5513_s7 = sshll.u32 %s9114_s21, 5  ;;  %s5514_s17 = sshll.u32 %s9114_s21, 4 }
  0xf5   : >> { %s761_s28 = scalar_lea.vmem %s8019_s12, %s5513_s7   ;;  %s762_s16 = scalar_lea.vmem %s8021_s23, %s5514_s17 [#allocation6]  }
  0xf6   : >> { %s7611_s26 = smov %s9114_s21  }
  0xfa PF: > { %s8034_s19 = sand.u32 1, %s9112_s25   ;;  %s5750_s20 = sshll.u32 %s8024_s27, 5 }
  0xfb   : > { %s8038_s26 = scalar_lea.vmem %s8019_s12, %s5750_s20   ;;  %s5751_s7 = sshll.u32 %s8024_s27, 4 }
  0xfc   : > { %s769_s17 = scalar_lea.vmem %s8021_s23, %s5751_s7 [#allocation6]   ;;  %p5518_p6 = scmp.le.s32.totalorder %s8034_s19, 0 }
  0xfd   : > { %s7618_s16 = smov (!%p5518_p6), %s769_s17   ;;  %s7622_s28 = smov (!%p5518_p6), %s8038_s26  }
  0xfe   : > { %5308 = sbr.rel (%p5518_p6) target bundleno = 271 (0x10f), region = 598  ;;  %s7626_s8 = smov (!%p5518_p6), 0  }
  0xff   : > { %s7630_s21 = smov (!%p5518_p6), 0  }
 0x105 LB: >> { %v779_v11 = vld [vmem:[%s7624_s28] sm:$0xff]  ;;  %s781_s25 = sadd.s32 1, %s7628_s8  ;;  %s773_s21 = sadd.s32 1, %s7632_s21   ;;  %s7632_s21 = sphi %s7630_s21, %s773_s21   ;;  %s7628_s8 = sphi %s7626_s8, %s7627_s8   ;;  %s7624_s28 = sphi %s7622_s28, %s786_s28   ;;  %s7620_s16 = sphi %s7618_s16, %s787_s16  }
 0x106   : >> { %780 = vst [vmem:[%s7620_s16] sm:$0xff] %v779_v11  ;;  %p782_p9 = scmp.ge.s32.totalorder %s781_s25, %s8034_s19  ;;  %p772_p11 = scmp.ge.s32.totalorder %s773_s21, %s8034_s19 }
 0x108   : >> { %s9116_s25 = smov (%p782_p9, %s781_s25), 0  ;;  %775 = sbr.rel (!%p772_p11) target bundleno = 261 (0x105), region = 604 }
 0x109   : >> { %s5519_s12 = sshll.u32 %s9116_s25, 4  ;;  %s5520_s23 = sshll.u32 %s9116_s25, 3 }
 0x10a   : >> { %s786_s28 = scalar_lea.vmem %s8038_s26, %s5519_s12   ;;  %s787_s16 = scalar_lea.vmem %s769_s17, %s5520_s23 [#allocation6]  }
 0x10b   : >> { %s7627_s8 = smov %s9116_s25  }
 0x10f PF: > { %793 = sbr.rel (!%p7826_p3) target bundleno = 327 (0x147), region = 228  ;;  %s795_s27 = sand.u32 (%p7826_p3), 1, %s7484_s10  }
 0x110   : > { %s5522_s20 = sshll.u32 (%p7826_p3), %s7496_s13, 1  ;;  %s5521_s7 = sshll.u32 (%p7826_p3), %s795_s27, 4 }
 0x111   : > { %s799_s8 = ssub.s32 (%p7826_p3), 5, %s5522_s20  ;;  %s5752_s16 = sshll.u32 (%p7826_p3), %s7496_s13, 2 }
 0x112   : > { %p800_p0 = scmp.lt.s32.totalorder (%p7826_p3), %s799_s8, 2  ;;  %s805_s28 = sadd.s32 (%p7826_p3), %s7500_s14, %s5752_s16 }
 0x113   : > { %s5526_s26 = sshll.u32 (%p7826_p3), %s805_s28, 3  ;;  %s8061_s12 = scalar_lea.vmem (%p7826_p3), [#allocation7], %s5521_s7  }
 0x114   : > { %s8059_s25 = scalar_lea.vmem (%p7826_p3), %s8999_s4, %s5526_s26  }
 0x116   : > { %s9118_s8 = smov (!%p800_p0, %s799_s8), 2 }
 0x117   : > { %s5523_s19 = sshll.u32 %s9118_s8, 7 }
 0x118   : > { %p5527_p2 = scmp.eq.s32.totalorder %s5523_s19, 0 }
 0x119   : > { %s8064_s23 = sshrl.u32 (!%p5527_p2), %s9118_s8, 1 }
 0x11a   : > { %810 = sbr.rel (%p5527_p2) target bundleno = 327 (0x147), region = 232  ;;  %p5528_p1 = scmp.le.s32.totalorder (!%p5527_p2), %s8064_s23, 0 }
 0x121   : > { %5322 = sbr.rel (%p5528_p1) target bundleno = 306 (0x132), region = 609  ;;  %s7634_s27 = smov (!%p5528_p1), %s8061_s12  }
 0x122   : > { %s7638_s20 = smov (!%p5528_p1), %s8059_s25   ;;  %s7642_s16 = smov (!%p5528_p1), 0  }
 0x123   : > { %s7646_s28 = smov (!%p5528_p1), 0  }
 0x128 LB: >> { %v874_v12 = vld [vmem:[%s7640_s20] sm:$0xff]  ;;  %v876_v13 = vld [vmem:[%s7640_s20 + $0x10] sm:$0xff]  ;;  %s878_s7 = sadd.s32 1, %s7644_s16  ;;  %s868_s28 = sadd.s32 1, %s7648_s28   ;;  %s7648_s28 = sphi %s7646_s28, %s868_s28   ;;  %s7644_s16 = sphi %s7642_s16, %s7643_s16   ;;  %s7640_s20 = sphi %s7638_s20, %s883_s20   ;;  %s7636_s27 = sphi %s7634_s27, %s884_s27  }
 0x129   : >> { %875 = vst [vmem:[%s7636_s27] sm:$0xff] %v874_v12  ;;  %877 = vst [vmem:[%s7636_s27 + $0x8] sm:$0xff] %v876_v13  ;;  %p879_p5 = scmp.ge.s32.totalorder %s878_s7, %s8064_s23  ;;  %p867_p6 = scmp.ge.s32.totalorder %s868_s28, %s8064_s23 }
 0x12b   : >> { %s9120_s7 = smov (%p879_p5, %s878_s7), 0  ;;  %870 = sbr.rel (!%p867_p6) target bundleno = 296 (0x128), region = 615 }
 0x12c   : >> { %s5529_s19 = sshll.u32 %s9120_s7, 5  ;;  %s5530_s26 = sshll.u32 %s9120_s7, 4 }
 0x12d   : >> { %s883_s20 = scalar_lea.vmem %s8059_s25, %s5529_s19   ;;  %s884_s27 = scalar_lea.vmem %s8061_s12, %s5530_s26 [#allocation7]  }
 0x12e   : >> { %s7643_s16 = smov %s9120_s7  }
 0x132 PF: > { %s8074_s17 = sand.u32 1, %s9118_s8   ;;  %s5753_s21 = sshll.u32 %s8064_s23, 5 }
 0x133   : > { %s8078_s16 = scalar_lea.vmem %s8059_s25, %s5753_s21   ;;  %s5754_s19 = sshll.u32 %s8064_s23, 4 }
 0x134   : > { %s891_s26 = scalar_lea.vmem %s8061_s12, %s5754_s19 [#allocation7]   ;;  %p5534_p9 = scmp.le.s32.totalorder %s8074_s17, 0 }
 0x135   : > { %s7650_s27 = smov (!%p5534_p9), %s891_s26   ;;  %s7654_s20 = smov (!%p5534_p9), %s8078_s16  }
 0x136   : > { %5336 = sbr.rel (%p5534_p9) target bundleno = 327 (0x147), region = 620  ;;  %s7658_s28 = smov (!%p5534_p9), 0  }
 0x137   : > { %s7662_s7 = smov (!%p5534_p9), 0  }
 0x13d LB: >> { %v901_v14 = vld [vmem:[%s7656_s20] sm:$0xff]  ;;  %s903_s8 = sadd.s32 1, %s7660_s28  ;;  %s895_s7 = sadd.s32 1, %s7664_s7   ;;  %s7664_s7 = sphi %s7662_s7, %s895_s7   ;;  %s7660_s28 = sphi %s7658_s28, %s7659_s28   ;;  %s7656_s20 = sphi %s7654_s20, %s908_s20   ;;  %s7652_s27 = sphi %s7650_s27, %s909_s27  }
 0x13e   : >> { %902 = vst [vmem:[%s7652_s27] sm:$0xff] %v901_v14  ;;  %p904_p11 = scmp.ge.s32.totalorder %s903_s8, %s8074_s17  ;;  %p894_p0 = scmp.ge.s32.totalorder %s895_s7, %s8074_s17 }
 0x140   : >> { %s9122_s8 = smov (%p904_p11, %s903_s8), 0  ;;  %897 = sbr.rel (!%p894_p0) target bundleno = 317 (0x13d), region = 626 }
 0x141   : >> { %s5535_s25 = sshll.u32 %s9122_s8, 4  ;;  %s5536_s12 = sshll.u32 %s9122_s8, 3 }
 0x142   : >> { %s908_s20 = scalar_lea.vmem %s8078_s16, %s5535_s25   ;;  %s909_s27 = scalar_lea.vmem %s891_s26, %s5536_s12 [#allocation7]  }
 0x143   : >> { %s7659_s28 = smov %s9122_s8  }
 0x147 PF: > { %915 = sbr.rel (!%p7826_p3) target bundleno = 383 (0x17f), region = 280  ;;  %s917_s23 = sand.u32 (%p7826_p3), 1, %s7484_s10  }
 0x148   : > { %s5538_s21 = sshll.u32 (%p7826_p3), %s7496_s13, 1  ;;  %s5537_s19 = sshll.u32 (%p7826_p3), %s917_s23, 4 }
 0x149   : > { %s921_s28 = ssub.s32 (%p7826_p3), 5, %s5538_s21  ;;  %s5755_s27 = sshll.u32 (%p7826_p3), %s7496_s13, 2 }
 0x14a   : > { %p922_p2 = scmp.lt.s32.totalorder (%p7826_p3), %s921_s28, 2  ;;  %s927_s20 = sadd.s32 (%p7826_p3), %s7500_s14, %s5755_s27 }
 0x14b   : > { %s5542_s16 = sshll.u32 (%p7826_p3), %s927_s20, 3  ;;  %s8101_s8 = scalar_lea.vmem (%p7826_p3), [#allocation8], %s5537_s19  }
 0x14c   : > { %s8099_s22 = scalar_lea.vmem (%p7826_p3), %s9000_s5, %s5542_s16  }
 0x14e   : > { %s9124_s28 = smov (!%p922_p2, %s921_s28), 2 }
 0x14f   : > { %s5539_s17 = sshll.u32 %s9124_s28, 7 }
 0x150   : > { %p5543_p3 = scmp.eq.s32.totalorder %s5539_s17, 0 }
 0x151   : > { %s8104_s25 = sshrl.u32 (!%p5543_p3), %s9124_s28, 1 }
 0x152   : > { %932 = sbr.rel (%p5543_p3) target bundleno = 383 (0x17f), region = 284  ;;  %p5544_p1 = scmp.le.s32.totalorder (!%p5543_p3), %s8104_s25, 0 }
 0x159   : > { %5350 = sbr.rel (%p5544_p1) target bundleno = 362 (0x16a), region = 631  ;;  %s7666_s12 = smov (!%p5544_p1), %s8101_s8  }
 0x15a   : > { %s7670_s23 = smov (!%p5544_p1), %s8099_s22   ;;  %s7674_s21 = smov (!%p5544_p1), 0  }
 0x15b   : > { %s7678_s27 = smov (!%p5544_p1), 0  }
 0x160 LB: >> { %v996_v15 = vld [vmem:[%s7672_s23] sm:$0xff]  ;;  %v998_v16 = vld [vmem:[%s7672_s23 + $0x10] sm:$0xff]  ;;  %s1000_s19 = sadd.s32 1, %s7676_s21  ;;  %s990_s27 = sadd.s32 1, %s7680_s27   ;;  %s7680_s27 = sphi %s7678_s27, %s990_s27   ;;  %s7676_s21 = sphi %s7674_s21, %s7675_s21   ;;  %s7672_s23 = sphi %s7670_s23, %s1005_s23   ;;  %s7668_s12 = sphi %s7666_s12, %s1006_s12  }
 0x161   : >> { %997 = vst [vmem:[%s7668_s12] sm:$0xff] %v996_v15  ;;  %999 = vst [vmem:[%s7668_s12 + $0x8] sm:$0xff] %v998_v16  ;;  %p1001_p5 = scmp.ge.s32.totalorder %s1000_s19, %s8104_s25  ;;  %p989_p6 = scmp.ge.s32.totalorder %s990_s27, %s8104_s25 }
 0x163   : >> { %s9126_s19 = smov (%p1001_p5, %s1000_s19), 0  ;;  %992 = sbr.rel (!%p989_p6) target bundleno = 352 (0x160), region = 637 }
 0x164   : >> { %s5545_s20 = sshll.u32 %s9126_s19, 5  ;;  %s5546_s17 = sshll.u32 %s9126_s19, 4 }
 0x165   : >> { %s1005_s23 = scalar_lea.vmem %s8099_s22, %s5545_s20   ;;  %s1006_s12 = scalar_lea.vmem %s8101_s8, %s5546_s17 [#allocation8]  }
 0x166   : >> { %s7675_s21 = smov %s9126_s19  }
 0x16a PF: > { %s8114_s16 = sand.u32 1, %s9124_s28   ;;  %s5756_s26 = sshll.u32 %s8104_s25, 5 }
 0x16b   : > { %s8118_s7 = scalar_lea.vmem %s8099_s22, %s5756_s26   ;;  %s5757_s21 = sshll.u32 %s8104_s25, 4 }
 0x16c   : > { %s1013_s20 = scalar_lea.vmem %s8101_s8, %s5757_s21 [#allocation8]   ;;  %p5550_p9 = scmp.le.s32.totalorder %s8114_s16, 0 }
 0x16d   : > { %s7682_s12 = smov (!%p5550_p9), %s1013_s20   ;;  %s7686_s23 = smov (!%p5550_p9), %s8118_s7  }
 0x16e   : > { %5364 = sbr.rel (%p5550_p9) target bundleno = 383 (0x17f), region = 642  ;;  %s7690_s27 = smov (!%p5550_p9), 0  }
 0x16f   : > { %s7694_s19 = smov (!%p5550_p9), 0  }
 0x175 LB: >> { %v1023_v17 = vld [vmem:[%s7688_s23] sm:$0xff]  ;;  %s1025_s28 = sadd.s32 1, %s7692_s27  ;;  %s1017_s19 = sadd.s32 1, %s7696_s19   ;;  %s7696_s19 = sphi %s7694_s19, %s1017_s19   ;;  %s7692_s27 = sphi %s7690_s27, %s7691_s27   ;;  %s7688_s23 = sphi %s7686_s23, %s1030_s23   ;;  %s7684_s12 = sphi %s7682_s12, %s1031_s12  }
 0x176   : >> { %1024 = vst [vmem:[%s7684_s12] sm:$0xff] %v1023_v17  ;;  %p1026_p11 = scmp.ge.s32.totalorder %s1025_s28, %s8114_s16  ;;  %p1016_p0 = scmp.ge.s32.totalorder %s1017_s19, %s8114_s16 }
 0x178   : >> { %s9128_s28 = smov (%p1026_p11, %s1025_s28), 0  ;;  %1019 = sbr.rel (!%p1016_p0) target bundleno = 373 (0x175), region = 648 }
 0x179   : >> { %s5551_s22 = sshll.u32 %s9128_s28, 4  ;;  %s5552_s8 = sshll.u32 %s9128_s28, 3 }
 0x17a   : >> { %s1030_s23 = scalar_lea.vmem %s8118_s7, %s5551_s22   ;;  %s1031_s12 = scalar_lea.vmem %s1013_s20, %s5552_s8 [#allocation8]  }
 0x17b   : >> { %s7691_s27 = smov %s9128_s28  }
 0x17f PF: > { %s1038_s25 = sand.u32 1, %s7476_s30   ;;  %s5759_s17 = sshll.u32 %s7500_s14, 11 }
 0x180   : > { %s5553_s26 = sshll.u32 %s1038_s25, 7  ;;  %s8132_s22 = scalar_lea.hbm %s9001_s6, %s5759_s17 }
 0x181   : > { %s1042_s12 = scalar_lea.vmem [#allocation9], %s5553_s26  ;;  %s8136_s16 = scalar_lea.sflag [#allocation10], %s1038_s25 }
 0x182   : > { %s1050_s23 = sshll.u32 %s1042_s12, 4  ;;  %s7130_s7 = scalar_lea.hbm %s8132_s22, 2048  ;;  %s8134_s23 = int_to_ptr.vmem [resolvable:$true] %s1050_s23 }
 0x183   : > { %p7131_p2 = scmp.ne.s32.totalorder %s8132_s22, %s7130_s7  ;;  %s7134_s28 = scalar_lea.hbm %s9001_s6, 4096 }
 0x184   : > { %p7135_p5 = scmp.lt.u32.totalorder %s8132_s22, %s9001_s6  ;;  %p7136_p6 = scmp.lt.u32.totalorder %s7134_s28, %s7130_s7 }
 0x185   : > { %p7132_p3 = pnand %p7131_p2, %p7840_p7  ;;  %p7138_p11 = scmp.lt.u32.totalorder %s7130_s7, %s8132_s22 }
 0x186   : > { %p7137_p9 = por %p7136_p6, %p7135_p5 }
 0x187   : > { %p7133_p1 = pneg %p7132_p3 }
 0x188   : > { %p7139_p0 = por %p7138_p11, %p7137_p9 }
 0x18a   : > { %p7140_p10 = pnand %p7139_p0, %p7133_p1 }
 0x18c   : > { %7143 = shalt.err (!%p7140_p10)
}
 0x18d   : > { %s7144_s25 = scalar_lea.vmem %s8134_s23, 2048  ;;  %s7698_s26 = smov [#allocation9]  }
 0x18e   : > { %p7145_p2 = scmp.ne.s32.totalorder %s8134_s23, %s7144_s25  ;;  %s7148_s21 = sshll.u32 %s7698_s26, 4  ;;  %s7149_s21 = int_to_ptr.vmem [resolvable:$false] %s7148_s21 }
 0x18f   : > { %s7150_s27 = scalar_lea.vmem %s7149_s21, 4096  ;;  %p7151_p4 = scmp.lt.s32.totalorder %s8134_s23, %s7149_s21 }
 0x190   : > { %p7146_p3 = pnand %p7145_p2, %p7840_p7  ;;  %p7152_p13 = scmp.lt.s32.totalorder %s7150_s27, %s7144_s25 }
 0x192   : > { %p7147_p8 = pneg %p7146_p3  ;;  %p7153_p5 = por %p7152_p13, %p7151_p4 }
 0x194   : > { %p7154_p6 = pnand %p7153_p5, %p7147_p8 }
 0x196   : > { %7157 = shalt.err (!%p7154_p6)
}
 0x197   : > { %s7699_s12 = smov 128   ;;  %s7700_s7 = smov 8  }
 0x198   : > { %6598 = dma.hbm_to_vmem [thread:$0]  (%p7840_p7), %s8132_s22, 2048, %s8134_s23, %s8136_s16, %s7699_s12, %s7699_s12, %s7700_s7  }
 0x199 PF: > { %p5557_p10 = scmp.ge.s32.totalorder %s7504_s15, 1  ;;  %p1058_p1 = scmp.lt.s32.totalorder %s7504_s15, 7 }
 0x19b   : > { %p1059_p9 = pnand %p5557_p10, %p1058_p1 }
 0x19c   : > { %s1065_s20 = sand.u32 (!%p1059_p9), 1, %s7480_s9   ;;  %s8164_s19 = sand.u32 (!%p1059_p9), 1, %s7472_s29  }
 0x19d   : > { %1062 = sbr.rel (%p1059_p9) target bundleno = 3926 (0xf56), region = 336  ;;  %s8168_s28 = sshll.u32 (!%p1059_p9), %s1065_s20, 4 }
 0x19e   : > { %s5564_s24 = sshll.u32 (!%p1059_p9), %s8164_s19, 7  ;;  %s1067_s22 = scalar_lea.vmem (!%p1059_p9), [#allocation3], %s8168_s28 }
 0x19f   : > { %s1074_s23 = scalar_lea.vmem (!%p1059_p9), [#allocation4], %s8168_s28  ;;  %s1081_s16 = scalar_lea.vmem (!%p1059_p9), [#allocation5], %s8168_s28 }
 0x1a0   : > { %s1088_s8 = scalar_lea.vmem (!%p1059_p9), [#allocation6], %s8168_s28  ;;  %s1095_s17 = scalar_lea.vmem (!%p1059_p9), [#allocation7], %s8168_s28 }
 0x1a1   : > { %s1102_s25 = scalar_lea.vmem (!%p1059_p9), [#allocation8], %s8168_s28  ;;  %s1107_s26 = scalar_lea.sflag (!%p1059_p9), [#allocation10], %s8164_s19 }
 0x1a2   : > { %s8178_s21 = scalar_lea.vmem (!%p1059_p9), [#allocation9], %s5564_s24 }
 0x1a4   : > { %7451 = dma.done.wait (%p7849_p12), %s1107_s26, 2048  }
 0x1a5   : > { %7453 = vsyncadd (%p7849_p12), %s1107_s26, 4294965248  ;;  %s8185_s27 = scalar_lea.vmem [#allocation12], %s8168_s28  ;;  %s8187_s12 = scalar_lea.vmem [#allocation13], %s5564_s24 }
 0x1a6   : > { %p5567_p7 = scmp.ne.s32.totalorder %s7488_s11, 0 }
 0x1a7   : > { %v1213_v18 = vld [vmem:[%s8178_s21] sm:$0xff] (!%p5567_p7)  ;;  %vm1229_vm0 = vcmask (!%p5567_p7), 523264   ;;  %v1214_v19 = vld [vmem:[%s8178_s21 + $0x8] sm:$0xff] (!%p5567_p7)  ;;  %v1215_v20 = vld [vmem:[%s8178_s21 + $0x10] sm:$0xff] (!%p5567_p7) }
 0x1a8   : > { %1212 = sbr.rel (%p5567_p7) target bundleno = 432 (0x1b0), region = 368  ;;  %1230 = vst.msk [vmem:[#allocation2] sm:$0xff] (!%p5567_p7), %vm1229_vm0, %v1213_v18  ;;  %1231 = vst.msk [vmem:[#allocation2 + $0x8] sm:$0xff] (!%p5567_p7), %vm1229_vm0, %v1214_v19  ;;  %v1216_v21 = vld [vmem:[%s8178_s21 + $0x18] sm:$0xff] (!%p5567_p7)  ;;  %v1217_v22 = vld [vmem:[%s8178_s21 + $0x20] sm:$0xff] (!%p5567_p7) }
 0x1a9   : > { %1232 = vst.msk [vmem:[#allocation2 + $0x10] sm:$0xff] (!%p5567_p7), %vm1229_vm0, %v1215_v20  ;;  %v1218_v23 = vld [vmem:[%s8178_s21 + $0x28] sm:$0xff] (!%p5567_p7)  ;;  %1233 = vst.msk [vmem:[#allocation2 + $0x18] sm:$0xff] (!%p5567_p7), %vm1229_vm0, %v1216_v21  ;;  %v1219_v24 = vld [vmem:[%s8178_s21 + $0x30] sm:$0xff] (!%p5567_p7) }
 0x1aa   : > { %1234 = vst.msk [vmem:[#allocation2 + $0x20] sm:$0xff] (!%p5567_p7), %vm1229_vm0, %v1217_v22  ;;  %1235 = vst.msk [vmem:[#allocation2 + $0x28] sm:$0xff] (!%p5567_p7), %vm1229_vm0, %v1218_v23  ;;  %v1220_v25 = vld [vmem:[%s8178_s21 + $0x38] sm:$0xff] (!%p5567_p7)  ;;  %v1221_v26 = vld [vmem:[%s8178_s21 + $0x40] sm:$0xff] (!%p5567_p7) }
 0x1ab   : > { %1236 = vst.msk [vmem:[#allocation2 + $0x30] sm:$0xff] (!%p5567_p7), %vm1229_vm0, %v1219_v24  ;;  %1237 = vst.msk [vmem:[#allocation2 + $0x38] sm:$0xff] (!%p5567_p7), %vm1229_vm0, %v1220_v25  ;;  %v1222_v27 = vld [vmem:[%s8178_s21 + $0x48] sm:$0xff] (!%p5567_p7)  ;;  %v1223_v28 = vld [vmem:[%s8178_s21 + $0x50] sm:$0xff] (!%p5567_p7) }
 0x1ac   : > { %1238 = vst.msk [vmem:[#allocation2 + $0x40] sm:$0xff] (!%p5567_p7), %vm1229_vm0, %v1221_v26  ;;  %v1224_v29 = vld [vmem:[%s8178_s21 + $0x58] sm:$0xff] (!%p5567_p7)  ;;  %1239 = vst.msk [vmem:[#allocation2 + $0x48] sm:$0xff] (!%p5567_p7), %vm1229_vm0, %v1222_v27  ;;  %v1225_v30 = vld [vmem:[%s8178_s21 + $0x60] sm:$0xff] (!%p5567_p7) }
 0x1ad   : > { %1240 = vst.msk [vmem:[#allocation2 + $0x50] sm:$0xff] (!%p5567_p7), %vm1229_vm0, %v1223_v28  ;;  %1241 = vst.msk [vmem:[#allocation2 + $0x58] sm:$0xff] (!%p5567_p7), %vm1229_vm0, %v1224_v29  ;;  %v1226_v31 = vld [vmem:[%s8178_s21 + $0x68] sm:$0xff] (!%p5567_p7)  ;;  %v1227_v32 = vld [vmem:[%s8178_s21 + $0x70] sm:$0xff] (!%p5567_p7) }
 0x1ae   : > { %1242 = vst.msk [vmem:[#allocation2 + $0x60] sm:$0xff] (!%p5567_p7), %vm1229_vm0, %v1225_v30  ;;  %1243 = vst.msk [vmem:[#allocation2 + $0x68] sm:$0xff] (!%p5567_p7), %vm1229_vm0, %v1226_v31  ;;  %v1228_v33 = vld [vmem:[%s8178_s21 + $0x78] sm:$0xff] (!%p5567_p7) }
 0x1af   : > { %1244 = vst.msk [vmem:[#allocation2 + $0x70] sm:$0xff] %vm1229_vm0, %v1227_v32  ;;  %1245 = vst.msk [vmem:[#allocation2 + $0x78] sm:$0xff] %vm1229_vm0, %v1228_v33 }
 0x1b0 PF: > { %s5568_s18 = sshll.u32 %s7488_s11, 4  ;;  %v1260_v34 = vlaneseq  ;;  %v1248_v35 = vld [vmem:[%s1074_s23] sm:$0xff]  ;;  %vm1296_vm1 = vcmask 130048   ;;  %v1249_v39 = vld [vmem:[%s1074_s23 + $0x8] sm:$0xff]  ;;  %v7701_v44 = vmov 0.0   ;;  %vm1432_vm6 = vcmask 523264  }
 0x1b1   : > { %s1259_s7 = ssub.s32 40, %s5568_s18  ;;  %v1254_v8 = vld [vmem:[%s1095_s17] sm:$0xff]  ;;  %v1255_v9 = vld [vmem:[%s1095_s17 + $0x8] sm:$0xff]  ;;  %s7702_s24 = smov 64   ;;  %vm8329_vm7 = vmpackc.low %vm1432_vm6, %vm1432_vm6  ;;  %vm4470_vm12 = vcmask 1048064  }
 0x1b2   : > { %v8225_v36 = vshrl.u32 %v1260_v34, 7  ;;  %v1263_v37 = vstv %s1259_s7  ;;  %v8227_v38 = vand.u32 127, %v1260_v34  ;;  %v1250_v11 = vld [vmem:[%s1081_s16] sm:$0xff]  ;;  %v1251_v17 = vld [vmem:[%s1081_s16 + $0x8] sm:$0xff]  ;;  %p5725_p12 = scmp.ne.s32.totalorder %s7488_s11, 2 }
 0x1b3   : > { %v1256_v12 = vld [vmem:[%s1102_s25] sm:$0xff]  ;;  %v1257_v18 = vld [vmem:[%s1102_s25 + $0x8] sm:$0xff] }
 0x1b4   : > { %v8232_v40 = vadd.s32 8, %v8225_v36  ;;  %vm8235_vm2 = vcmp.lt.s32.totalorder %v8225_v36, %v1263_v37  ;;  %vm8241_vm3 = vcmp.ge.s32.totalorder %v8225_v36, %v8227_v38  ;;  %v1391_v55 = vsub.s32 7, %v8225_v36  ;;  %v1246_v29 = vld [vmem:[%s1067_s22] sm:$0xff]  ;;  %v1253_v31 = vld [vmem:[%s1088_s8 + $0x8] sm:$0xff] }
 0x1b5   : > { %v1270_v43 = vsel %vm8235_vm2, %v1248_v35, 1.0  ;;  %v5569_v45 = vsel %vm8241_vm3, 1.0, %v7701_v44  ;;  %v1278_v14 = vsel %vm8235_vm2, %v1254_v8, 0.0  ;;  %v1274_v20 = vsel %vm8235_vm2, %v1250_v11, 0.0 }
 0x1b6   : > { %vm8250_vm4 = vcmp.lt.s32.totalorder %v8232_v40, %v1263_v37  ;;  %7112 = vlog2.f32 %v1270_v43  ;;  %5963 = vmatprep.mubr.msk.f32.mxu1 %vm1296_vm1, %v5569_v45  ;;  %vm8259_vm5 = vcmp.ge.s32.totalorder %v8232_v40, %v8227_v38  ;;  %v1280_v21 = vsel %vm8235_vm2, %v1256_v12, 0.0 }
 0x1b7   : > { %v1271_v47 = vsel %vm8250_vm4, %v1249_v39, 1.0  ;;  %v5570_v54 = vsel %vm8259_vm5, 1.0, %v7701_v44  ;;  %v1279_v16 = vsel %vm8250_vm4, %v1255_v9, 0.0  ;;  %v1275_v27 = vsel %vm8250_vm4, %v1251_v17, 0.0  ;;  %vm8387_vm8 = vmpackc.low %vm8250_vm4, %vm8235_vm2  ;;  %v8397_v9 = vld [vmem:[#allocation2] sm:$0xff]  ;;  %v8426_v17 = vld [vmem:[#allocation2 + $0x10] sm:$0xff] }
 0x1b8   : > { %7114 = vlog2.f32 %v1271_v47  ;;  %v1281_v28 = vsel %vm8250_vm4, %v1257_v18, 0.0  ;;  %v1272_v44 = vsel %vm8235_vm2, %v1246_v29, 0.0  ;;  %v1277_v47 = vsel %vm8250_vm4, %v1253_v31, 0.0  ;;  %v8428_v18 = vld [vmem:[#allocation2 + $0x18] sm:$0xff] }
 0x1b9   : > { %vm8416_vm9 = vcmp.gt.s32.totalorder %v8225_v36, %v8227_v38  ;;  %vm8422_vm10 = vcmp.gt.s32.totalorder %v8232_v40, %v8227_v38  ;;  %v8436_v38 = vpack.c.bf16 %v8428_v18, %v8426_v17 }
 0x1ba   : > { %vm8499_vm11 = vmpackc.low %vm8422_vm10, %vm8416_vm9 }
 0x1c0   : > { %v7113_v48 = vpop.eup %7112 }
 0x1c1   : > { %v1293_v49 = vmul.f32 0.6931472, %v7113_v48 }
 0x1c2   : > { %v7115_v50 = vpop.eup %7114 }
 0x1c3   : > { %v1295_v51 = vmul.f32 0.6931472, %v7115_v50 }
 0x1c5   : > { %v6302_v52 = vpack.c.bf16 %v1295_v51, %v1293_v49 }
 0x1c7   : > { %6303 = vmatprep.subr.bf16.mxu1 %v6302_v52 }
 0x1c8   : > { %6305 = vmatpush3.bf16.msra.mxu1 %v6302_v52 }
 0x1cb   : > { %5964 = vmatmul.mubr.msk.f32.vlgmr.msra.gmra.mrb[0].mxu1 %vm1296_vm1, %v5570_v54 }
 0x29e   : > { %v5965_v56 = vpop.f32.mrb[0].mxu1 }
 0x29f   : > { %v1379_v57 = vsub.f32 %v5965_v56, %v1295_v51  ;;  %v1380_v58 = vmul.f32 0.5, %v5965_v56  ;;  %v1383_v59 = vmul.f32 1.442695, %v5965_v56  ;;  %v1369_v60 = vpop.f32.mrb[1].mxu1  ;;  %v1392_v61 = vrot.slane %v5965_v56, %v1391_v55 }
 0x2a0   : > { %v1378_v62 = vsub.f32 %v1369_v60, %v1293_v49  ;;  %v1381_v7 = vmul.f32 1.442695, %v1369_v60 }
 0x2a1   : > { %7116 = vpow2.f32 %v1383_v59  ;;  %v1387_v63 = vmul.f32 1.442695, %v1379_v57  ;;  %v1399_v0 = vsub.f32 0.0, %v1380_v58  ;;  %v1393_v1 = vsub.f32 %v1392_v61, %v1369_v60 }
 0x2a2   : > { %v1385_v2 = vmul.f32 1.442695, %v1378_v62  ;;  %v1394_v3 = vsub.f32 %v1392_v61, %v5965_v56 }
 0x2a3   : > { %7118 = vpow2.f32 %v1387_v63  ;;  %v1400_v4 = vmul.f32 1.442695, %v1399_v0  ;;  %v1395_v5 = vmul.f32 1.442695, %v1393_v1  ;;  %v1247_v1 = vld [vmem:[%s1067_s22 + $0x8] sm:$0xff] }
 0x2a4   : > { %7120 = vpow2.f32 %v1385_v2  ;;  %v1397_v6 = vmul.f32 1.442695, %v1394_v3  ;;  %v1273_v2 = vsel %vm8250_vm4, %v1247_v1, 0.0 }
 0x2a5   : > { %7122 = vpow2.f32 %v1400_v4 }
 0x2a6   : > { %7124 = vpow2.f32 %v1395_v5  ;;  %v1252_v5 = vld [vmem:[%s1088_s8] sm:$0xff] }
 0x2a7   : > { %7126 = vpow2.f32 %v1397_v6  ;;  %v1276_v6 = vsel %vm8235_vm2, %v1252_v5, 0.0 }
 0x2a8   : > { %7128 = vpow2.f32 %v1381_v7  ;;  %v8381_v7 = vpack.c.bf16 %v1253_v31, %v1252_v5 }
 0x2ab   : > { %v8271_v10 = vpop.eup %7116 }
 0x2ac   : > { %v8278_v13 = vrot.slane %v8271_v10, %v1391_v55  ;;  %v8368_v3 = vmul.f32 %v8271_v10, %v1273_v2  ;;  %v8399_v10 = vld [vmem:[#allocation2 + $0x8] sm:$0xff] }
 0x2ad   : > { %v7119_v15 = vpop.eup %7118  ;;  %v8403_v41 = vpack.c.bf16 %v8399_v10, %v8397_v9 }
 0x2ae   : > { %v7121_v19 = vpop.eup %7120  ;;  %v8294_v26 = vmul.f32 %v7119_v15, %v1279_v16 }
 0x2af   : > { %v7123_v22 = vpop.eup %7122  ;;  %v8292_v23 = vmul.f32 %v7121_v19, %v1278_v14 }
 0x2b0   : > { %v7125_v24 = vpop.eup %7124  ;;  %v1405_v25 = vrot.slane %v7123_v22, %v1391_v55 }
 0x2b1   : > { %v7127_v30 = vpop.eup %7126  ;;  %v8304_v32 = vmul.f32 %v7125_v24, %v1274_v20  ;;  %v8306_v33 = vmul.f32 %v7125_v24, %v1280_v21 }
 0x2b2   : > { %v1415_v34 = vmul.f32 %v8294_v26, %v1405_v25  ;;  %v1414_v35 = vmul.f32 %v8292_v23, %v1405_v25  ;;  %v1406_v37 = vmul.f32 %v7125_v24, %v1405_v25  ;;  %v1407_v39 = vmul.f32 %v7127_v30, %v1405_v25  ;;  %v7129_v51 = vpop.eup %7128 }
 0x2b3   : > { %v8310_v43 = vmul.f32 %v7127_v30, %v1275_v27  ;;  %v1421_v45 = vmul.f32 %v7127_v30, %v1281_v28  ;;  %v8337_v63 = vmul.f32 %v7129_v51, %v1272_v44  ;;  %v8371_v4 = vmul.f32 %v8368_v3, %v1405_v25  ;;  %v8475_v30 = vld [vmem:[#allocation2 + $0x38] sm:$0xff] }
 0x2b4   : > { %3124 = vrot.lane.b32.xlu1 %v1415_v34, %s7702_s24  ;;  %5970 = vmatprep.mubr.msk.f32.mxu1 %vm1432_vm6, %v1414_v35  ;;  %v1417_v48 = vmul.f32 %v1407_v39, %v1281_v28  ;;  %v1418_v49 = vmul.f32 %v1406_v37, %v1274_v20  ;;  %v1419_v50 = vmul.f32 %v1407_v39, %v1275_v27  ;;  %v8459_v27 = vld [vmem:[#allocation2 + $0x28] sm:$0xff] }
 0x2b5   : > { %5977 = vmatprep.mubr.msk.f32.mxu0 %vm1432_vm6, %v1414_v35  ;;  %v1416_v52 = vmul.f32 %v1406_v37, %v1280_v21  ;;  %v7102_v54 = vpack.i.bf16 %v1421_v45, %v8306_v33  ;;  %v8321_v55 = vpack.c.bf16 %v1421_v45, %v8306_v33  ;;  %v8325_v56 = vpack.c.bf16 %v8310_v43, %v8304_v32 }
 0x2b6   : > { %v7092_v57 = vpack.i.bf16 %v1419_v50, %v1418_v49  ;;  %v6312_v58 = vpack.c.bf16 %v1419_v50, %v1418_v49  ;;  %v7107_v60 = vpack.i.bf16 %v8310_v43, %v8304_v32  ;;  %v1412_v0 = vmul.f32 %v8337_v63, %v1405_v25  ;;  %v8457_v25 = vld [vmem:[#allocation2 + $0x20] sm:$0xff] }
 0x2b7   : > { %v6306_v61 = vpack.c.bf16 %v1417_v48, %v1416_v52  ;;  %v7097_v62 = vpack.i.bf16 %v1417_v48, %v1416_v52  ;;  %v8465_v29 = vpack.c.bf16 %v8459_v27, %v8457_v25 }
 0x2b8   : > { %3466 = vrot.lane.b32.xlu1 %v1277_v47, %s7702_s24  ;;  %7093 = vrot.lane.b32.xlu0 %v7092_v57, %s7702_s24 }
 0x2b9   : > { %6308 = vmatprep.subr.msk.bf16.mxu1 %vm8329_vm7, %v6306_v61  ;;  %6314 = vmatprep.subr.msk.bf16.mxu0 %vm8329_vm7, %v6312_v58 }
 0x2ba   : > { %6311 = vmatpush3.bf16.xpose.msk.msra.mxu1 %vm8329_vm7, %v6306_v61  ;;  %6317 = vmatpush3.bf16.xpose.msk.msra.mxu0 %vm8329_vm7, %v6312_v58 }
 0x2bb   : > { %6320 = vmatprep.subr.msk.bf16.mxu1 %vm8329_vm7, %v6306_v61  ;;  %6326 = vmatprep.subr.msk.bf16.mxu0 %vm8329_vm7, %v6312_v58 }
 0x2bc   : > { %3122 = vrot.lane.b32.xlu0 %v1414_v35, %s7702_s24  ;;  %3300 = vrot.lane.b32.xlu1 %v1412_v0, %s7702_s24 }
 0x2c0   : > { %7098 = vrot.lane.b32.xlu0 %v7097_v62, %s7702_s24 }
 0x2c1   : > { %5971 = vmatmul.mubr.msk.f32.vlgmr.msra.gmra.mrb[2].mxu1 %vm1432_vm6, %v1415_v34  ;;  %5978 = vmatmul.mubr.msk.f32.vlgmr.msra.gmra.mrb[0].mxu0 %vm1432_vm6, %v1415_v34 }
 0x2c2   : > { %6323 = vmatpush3.bf16.xpose.msk.msra.mxu1 %vm8329_vm7, %v6306_v61  ;;  %5984 = vmatprep.mubr.msk.f32.mxu1 %vm1432_vm6, %v1412_v0 }
 0x2c3   : > { %6329 = vmatpush3.bf16.xpose.msk.msra.mxu0 %vm8329_vm7, %v6312_v58  ;;  %5991 = vmatprep.mubr.msk.f32.mxu0 %vm1432_vm6, %v1412_v0 }
 0x2c4   : > { %6332 = vmatprep.subr.msk.bf16.mxu1 %vm8387_vm8, %v8381_v7 }
 0x2c9   : > { %5985 = vmatmul.mubr.msk.f32.vlgmr.msra.gmra.mrb[4].mxu1 %vm1432_vm6, %v8371_v4 }
 0x2ca   : > { %5992 = vmatmul.mubr.msk.f32.vlgmr.msra.gmra.mrb[2].mxu0 %vm1432_vm6, %v8371_v4  ;;  %6335 = vmatpush3.bf16.msk.msra.mxu1 %vm8387_vm8, %v8381_v7 }
 0x2cb   : > { %6338 = vmatprep.subr.msk.bf16.mxu1 %vm8329_vm7, %v8403_v41 }
 0x2de   : > { %2936 = vxpose.xlu0.b32.start [1/2] (short) (narrow) %v1276_v6, 64 }
 0x2e2   : > { %2937 = vxpose.xlu0.b32.end [2/2] (short) (narrow) %v1277_v47, 64 }
 0x323   : > { %3464 = vrot.lane.b32.xlu0 %v1276_v6, %s7702_s24 }
 0x327   : > { %3551 = vrot.lane.b32.xlu0 %v8292_v23, %s7702_s24 }
 0x32b   : > { %4296 = vrot.lane.b32.xlu0 %v8337_v63, %s7702_s24 }
 0x32f   : > { %7103 = vrot.lane.b32.xlu0 %v7102_v54, %s7702_s24 }
 0x394   : > { %v5972_v12 = vpop.f32.mrb[2].mxu1  ;;  %v5979_v14 = vpop.f32.mrb[0].mxu0 }
 0x395   : > { %v1511_v15 = vpop.f32.mrb[3].mxu1  ;;  %v1594_v16 = vpop.f32.mrb[1].mxu0  ;;  %v1604_v40 = vsel %vm8422_vm10, %v5979_v14, 0.0  ;;  %v1521_v39 = vsel %vm8422_vm10, %v5972_v12, 0.0 }
 0x396   : > { %v1520_v36 = vsel %vm8416_vm9, %v1511_v15, 0.0  ;;  %v6364_v19 = vpack.c.bf16 %v5972_v12, %v1511_v15  ;;  %v1603_v20 = vsel %vm8416_vm9, %v1594_v16, 0.0 }
 0x397   : > { %5998 = vmatprep.mubr.msk.f32.mxu1 %vm1296_vm1, %v1603_v20  ;;  %6024 = vmatprep.mubr.msk.f32.mxu0 %vm1296_vm1, %v1520_v36 }
 0x398   : > { %5999 = vmatmul.mubr.msk.f32.vlgmr.msra.gmra.mrb[6].mxu1 %vm1296_vm1, %v1604_v40 }
 0x399   : > { %6341 = vmatpush3.bf16.xpose.msk.msra.mxu1 %vm8329_vm7, %v8403_v41  ;;  %6017 = vmatprep.mubr.msk.f32.mxu1 %vm1432_vm6, %v8292_v23  ;;  %v8473_v23 = vld [vmem:[#allocation2 + $0x30] sm:$0xff] }
 0x39a   : > { %6344 = vmatprep.subr.msk.bf16.mxu1 %vm8329_vm7, %v8436_v38  ;;  %v8479_v31 = vpack.c.bf16 %v8475_v30, %v8473_v23 }
 0x39c   : > { %v8451_v21 = vpop.f32.mrb[4].mxu1 }
 0x39d   : > { %v8453_v22 = vpop.f32.mrb[2].mxu0  ;;  %v8455_v24 = vpop.f32.mrb[5].mxu1 }
 0x39e   : > { %v8461_v28 = vpop.f32.mrb[3].mxu0 }
 0x3a1   : > { %6347 = vmatpush3.bf16.xpose.msk.msra.mxu1 %vm8329_vm7, %v8436_v38 }
 0x3a2   : > { %6350 = vmatprep.subr.msk.bf16.mxu1 %vm8329_vm7, %v8465_v29 }
 0x3a9   : > { %6353 = vmatpush3.bf16.xpose.msk.msra.mxu1 %vm8329_vm7, %v8465_v29 }
 0x3aa   : > { %6356 = vmatprep.subr.msk.bf16.mxu1 %vm8329_vm7, %v8479_v31 }
 0x3b1   : > { %6359 = vmatpush3.bf16.xpose.msk.msra.mxu1 %vm8329_vm7, %v8479_v31 }
 0x3b2   : > { %6425 = vmatprep.subr.bf16.mxu1 %v8321_v55 }
 0x3b8   : > { %6018 = vmatmul.mubr.msk.f32.vlgmr.msra.gmra.mrb[6].mxu1 %vm1432_vm6, %v8294_v26 }
 0x3b9   : > { %6427 = vmatpush3.bf16.msra.mxu1 %v8321_v55 }
 0x3ba   : > { %6429 = vmatprep.subr.bf16.mxu1 %v8325_v56 }
 0x48b   : > { %v6019_v33 = vpop.f32.mrb[6].mxu1 }
 0x48c   : > { %v1942_v34 = vpop.f32.mrb[7].mxu1 }
 0x48d   : > { %v6360_v35 = vpack.c.bf16 %v6019_v33, %v1942_v34 }
 0x48f   : > { %6361 = vmatprep.subr.bf16.mxu0 %v6360_v35 }
 0x490   : > { %6363 = vmatpush3.bf16.msra.mxu0 %v6360_v35  ;;  %v1764_v35 = vsel %vm8259_vm5, %v8453_v22, 0.0 }
 0x491   : > { %6366 = vmatprep.subr.msk.bf16.mxu0 %vm8499_vm11, %v6364_v19 }
 0x493   : > { %6025 = vmatmul.mubr.msk.f32.vlgmr.msra.gmra.mrb[4].mxu0 %vm1296_vm1, %v1521_v39 }
 0x494   : > { %6369 = vmatpush3.bf16.msk.msra.mxu0 %vm8499_vm11, %v6364_v19  ;;  %6031 = vmatprep.mubr.msk.f32.mxu0 %vm1296_vm1, %v1520_v36  ;;  %v1686_v36 = vsel %vm8241_vm3, %v8455_v24, 0.0  ;;  %v1687_v24 = vsel %vm8259_vm5, %v8451_v21, 0.0 }
 0x497   : > { %6032 = vmatmul.mubr.msk.f32.vlgmr.msra.gmra.mrb[6].mxu0 %vm1296_vm1, %v1521_v39 }
 0x566   : > { %v6026_v44 = vpop.f32.mrb[4].mxu0 }
 0x567   : > { %v2033_v45 = vadd.f32 %v6026_v44, %v6019_v33  ;;  %v2023_v47 = vpop.f32.mrb[5].mxu0 }
 0x568   : > { %v2032_v48 = vadd.f32 %v2023_v47, %v1942_v34 }
 0x56a   : > { %v6370_v49 = vpack.c.bf16 %v2033_v45, %v2032_v48  ;;  %v6033_v50 = vpop.f32.mrb[6].mxu0 }
 0x56b   : > { %v2100_v51 = vpop.f32.mrb[7].mxu0 }
 0x56c   : > { %v6374_v52 = vpack.c.bf16 %v6033_v50, %v2100_v51  ;;  %6371 = vmatprep.subr.bf16.mxu0 %v6370_v49  ;;  %6038 = vmatprep.mubr.msk.f32.mxu0 %vm1296_vm1, %v2100_v51 }
 0x56d   : > { %6373 = vmatpush3.bf16.msra.mxu0 %v6370_v49 }
 0x56e   : > { %6375 = vmatprep.subr.bf16.mxu0 %v6374_v52 }
 0x570   : > { %6039 = vmatmul.mubr.msk.f32.vlgmr.msra.gmra.mrb[8].mxu0 %vm1296_vm1, %v6033_v50 }
 0x571   : > { %6377 = vmatpush3.bf16.msra.mxu0 %v6374_v52  ;;  %6045 = vmatprep.mubr.msk.f32.mxu0 %vm1296_vm1, %v2100_v51 }
 0x574   : > { %6046 = vmatmul.mubr.msk.f32.vlgmr.msra.gmra.mrb[10].mxu0 %vm1296_vm1, %v6033_v50 }
 0x643   : > { %v6040_v54 = vpop.f32.mrb[8].mxu0 }
 0x644   : > { %v2191_v55 = vadd.f32 %v6040_v54, %v2033_v45  ;;  %v2181_v57 = vpop.f32.mrb[9].mxu0 }
 0x645   : > { %v2190_v58 = vadd.f32 %v2181_v57, %v2032_v48 }
 0x647   : > { %v6378_v61 = vpack.c.bf16 %v2191_v55, %v2190_v58  ;;  %v6047_v62 = vpop.f32.mrb[10].mxu0 }
 0x648   : > { %v2258_v0 = vpop.f32.mrb[11].mxu0 }
 0x649   : > { %v6382_v1 = vpack.c.bf16 %v6047_v62, %v2258_v0  ;;  %6379 = vmatprep.subr.bf16.mxu0 %v6378_v61  ;;  %6052 = vmatprep.mubr.msk.f32.mxu0 %vm1296_vm1, %v2258_v0 }
 0x64a   : > { %6381 = vmatpush3.bf16.msra.mxu0 %v6378_v61 }
 0x64b   : > { %6383 = vmatprep.subr.bf16.mxu0 %v6382_v1 }
 0x64d   : > { %6053 = vmatmul.mubr.msk.f32.vlgmr.msra.gmra.mrb[12].mxu0 %vm1296_vm1, %v6047_v62 }
 0x64e   : > { %6385 = vmatpush3.bf16.msra.mxu0 %v6382_v1  ;;  %6059 = vmatprep.mubr.msk.f32.mxu0 %vm1296_vm1, %v2258_v0  ;;  %v8629_v0 = vld [vmem:[#allocation2 + $0x40] sm:$0xff]  ;;  %v8631_v1 = vld [vmem:[#allocation2 + $0x48] sm:$0xff] }
 0x651   : > { %6060 = vmatmul.mubr.msk.f32.vlgmr.msra.gmra.mrb[14].mxu0 %vm1296_vm1, %v6047_v62 }
 0x720   : > { %v6054_v2 = vpop.f32.mrb[12].mxu0 }
 0x721   : > { %v2349_v5 = vadd.f32 %v6054_v2, %v2191_v55  ;;  %v2339_v6 = vpop.f32.mrb[13].mxu0  ;;  %v8635_v2 = vpack.c.bf16 %v8631_v1, %v8629_v0 }
 0x722   : > { %v2348_v12 = vadd.f32 %v2339_v6, %v2190_v58 }
 0x724   : > { %v6386_v14 = vpack.c.bf16 %v2349_v5, %v2348_v12  ;;  %v6061_v15 = vpop.f32.mrb[14].mxu0 }
 0x725   : > { %v2416_v16 = vpop.f32.mrb[15].mxu0 }
 0x726   : > { %6387 = vmatprep.subr.bf16.mxu0 %v6386_v14  ;;  %6066 = vmatprep.mubr.msk.f32.mxu0 %vm1296_vm1, %v2416_v16 }
 0x727   : > { %6389 = vmatpush3.bf16.msra.mxu0 %v6386_v14  ;;  %v8648_v14 = vld [vmem:[#allocation2 + $0x58] sm:$0xff] }
 0x72a   : > { %6067 = vmatmul.mubr.msk.f32.vlgmr.msra.gmra.mrb[16].mxu0 %vm1296_vm1, %v6061_v15 }
 0x72b   : > { %6073 = vmatprep.mubr.msk.f32.mxu0 %vm1296_vm1, %v1686_v36 }
 0x7fd   : > { %v6068_v19 = vpop.f32.mrb[16].mxu0 }
 0x7fe   : > { %v2507_v20 = vadd.f32 %v6068_v19, %v2349_v5  ;;  %v2497_v40 = vpop.f32.mrb[17].mxu0 }
 0x7ff   : > { %v2506_v33 = vadd.f32 %v2497_v40, %v2348_v12  ;;  %v8646_v12 = vld [vmem:[#allocation2 + $0x50] sm:$0xff] }
 0x800   : > { %v8654_v19 = vpack.c.bf16 %v8648_v14, %v8646_v12 }
 0x801   : > { %v6390_v34 = vpack.c.bf16 %v2507_v20, %v2506_v33  ;;  %2767 = vxpose.xlu1.b32.start [1/2] (short) (narrow) %v2506_v33, 64  ;;  %v8667_v33 = vld [vmem:[#allocation2 + $0x60] sm:$0xff] }
 0x803   : > { %6391 = vmatprep.subr.bf16.mxu0 %v6390_v34 }
 0x804   : > { %6393 = vmatpush3.bf16.msra.mxu0 %v6390_v34  ;;  %v8669_v34 = vld [vmem:[#allocation2 + $0x68] sm:$0xff] }
 0x805   : > { %2768 = vxpose.xlu1.b32.end [2/2] (short) (narrow) %v2507_v20, 64  ;;  %6396 = vmatprep.subr.msk.bf16.mxu0 %vm8329_vm7, %v8403_v41 }
 0x807   : > { %6074 = vmatmul.mubr.msk.f32.vlgmr.msra.gmra.mrb[18].mxu0 %vm1296_vm1, %v1687_v24  ;;  %v8673_v24 = vpack.c.bf16 %v8669_v34, %v8667_v33 }
 0x808   : > { %6092 = vmatprep.mubr.msk.f32.mxu0 %vm1432_vm6, %v8337_v63  ;;  %v7094_v63 = vpop.permute.xlu0 %7093 }
 0x80c   : > { %v3123_v39 = vpop.permute.xlu0 %3122 }
 0x80d   : > { %6399 = vmatpush3.bf16.xpose.msk.msra.mxu0 %vm8329_vm7, %v8403_v41  ;;  %v7096_v41 = vunpack.i.h.bf16 %v7094_v63 }
 0x80e   : > { %6402 = vmatprep.subr.msk.bf16.mxu0 %vm8329_vm7, %v8436_v38 }
 0x810   : > { %v7099_v8 = vpop.permute.xlu0 %7098 }
 0x811   : > { %v7100_v54 = vunpack.i.l.bf16 %v7099_v8 }
 0x814   : > { %v2952_v22 = vpop.trf.xlu0 }
 0x815   : > { %6405 = vmatpush3.bf16.xpose.msk.msra.mxu0 %vm8329_vm7, %v8436_v38  ;;  %v7095_v38 = vunpack.i.l.bf16 %v7094_v63 }
 0x816   : > { %6408 = vmatprep.subr.msk.bf16.mxu0 %vm8329_vm7, %v8465_v29 }
 0x817   : > { %v6438_v21 = vpack.c.bf16 %v7096_v41, %v7095_v38  ;;  %v8683_v41 = vld [vmem:[#allocation2 + $0x70] sm:$0xff]  ;;  %v8685_v38 = vld [vmem:[#allocation2 + $0x78] sm:$0xff] }
 0x818   : > { %v2953_v44 = vpop.trf.xlu0 }
 0x81d   : > { %6411 = vmatpush3.bf16.xpose.msk.msra.mxu0 %vm8329_vm7, %v8465_v29  ;;  %v1763_v29 = vsel %vm8241_vm3, %v8461_v28, 0.0 }
 0x81e   : > { %6414 = vmatprep.subr.msk.bf16.mxu0 %vm8329_vm7, %v8479_v31 }
 0x825   : > { %6417 = vmatpush3.bf16.xpose.msk.msra.mxu0 %vm8329_vm7, %v8479_v31  ;;  %v8570_v31 = vpop.permute.xlu1 %3124 }
 0x826   : > { %6420 = vmatprep.subr.msk.bf16.mxu0 %vm8387_vm8, %v8381_v7 }
 0x82c   : > { %6093 = vmatmul.mubr.msk.f32.vlgmr.msra.gmra.mrb[18].mxu0 %vm1432_vm6, %v8368_v3 }
 0x82d   : > { %6423 = vmatpush3.bf16.msk.msra.mxu0 %vm8387_vm8, %v8381_v7  ;;  %6099 = vmatprep.mubr.msk.f32.mxu0 %vm1296_vm1, %v1763_v29  ;;  %v3467_v7 = vpop.permute.xlu1 %3466  ;;  %v8689_v29 = vpack.c.bf16 %v8685_v38, %v8683_v41 }
 0x82e   : > { %6440 = vmatprep.subr.msk.bf16.mxu0 %vm8329_vm7, %v6438_v21 }
 0x831   : > { %v3301_v28 = vpop.permute.xlu1 %3300 }
 0x834   : > { %6100 = vmatmul.mubr.msk.f32.vlgmr.msra.gmra.mrb[18].mxu0 %vm1296_vm1, %v1764_v35 }
 0x835   : > { %6145 = vmatprep.mubr.msk.f32.mxu0 %vm1432_vm6, %v3123_v39 }
 0x836   : > { %6443 = vmatpush3.bf16.xpose.msk.msra.mxu0 %vm8329_vm7, %v6438_v21 }
 0x837   : > { %6452 = vmatprep.subr.msk.bf16.mxu0 %vm8329_vm7, %v6438_v21 }
 0x83b   : > { %3302 = vrot.lane.b32.xlu1 %v8371_v4, %s7702_s24  ;;  %v2954_v4 = vpop.trf.xlu0 }
 0x83d   : > { %6146 = vmatmul.mubr.msk.f32.vlgmr.msra.gmra.mrb[20].mxu0 %vm1432_vm6, %v8570_v31 }
 0x83e   : > { %6455 = vmatpush3.bf16.xpose.msk.msra.mxu0 %vm8329_vm7, %v6438_v21  ;;  %6159 = vmatprep.mubr.msk.f32.mxu0 %vm1432_vm6, %v3301_v28 }
 0x83f   : > { %3553 = vrot.lane.b32.xlu1 %v8294_v26, %s7702_s24  ;;  %v2955_v45 = vpop.trf.xlu0  ;;  %v7101_v26 = vunpack.i.h.bf16 %v7099_v8 }
 0x841   : > { %v6432_v55 = vpack.c.bf16 %v7101_v26, %v7100_v54  ;;  %v2761_v54 = vmul.f32 %v8278_v13, %v8426_v17  ;;  %v2766_v17 = vmul.f32 %v8278_v13, %v8475_v30 }
 0x843   : > { %4298 = vrot.lane.b32.xlu1 %v8368_v3, %s7702_s24  ;;  %v2956_v47 = vpop.trf.xlu0 }
 0x847   : > { %7108 = vrot.lane.b32.xlu1 %v7107_v60, %s7702_s24  ;;  %v2957_v48 = vpop.trf.xlu0 }
 0x84b   : > { %v2958_v49 = vpop.trf.xlu0 }
 0x84f   : > { %v2959_v50 = vpop.trf.xlu0 }
 0x853   : > { %v3465_v51 = vpop.permute.xlu0 %3464 }
 0x854   : > { %v8621_v62 = vpack.c.bf16 %v3467_v7, %v3465_v51 }
 0x857   : > { %v3552_v40 = vpop.permute.xlu0 %3551 }
 0x85b   : > { %v8681_v63 = vpop.permute.xlu0 %4296 }
 0x870   : > { %4662 = vxpose.xlu1.b32.start [1/2] (short) (narrow) %v3465_v51, 64 }
 0x874   : > { %4663 = vxpose.xlu1.b32.end [2/2] (short) (narrow) %v3467_v7, 64 }
 0x881   : > { %v2783_v52 = vpop.trf.xlu1 }
 0x882   : > { %6106 = vmatprep.mubr.msk.f32.mxu1 %vm1296_vm1, %v2783_v52  ;;  %v2762_v52 = vmul.f32 %v8278_v13, %v8428_v18  ;;  %v2763_v18 = vmul.f32 %v8278_v13, %v8457_v25 }
 0x885   : > { %v2784_v3 = vpop.trf.xlu1 }
 0x886   : > { %6107 = vmatmul.mubr.msk.f32.vlgmr.msra.gmra.mrb[8].mxu1 %vm1296_vm1, %v2784_v3 }
 0x887   : > { %6431 = vmatpush3.bf16.msra.mxu1 %v8325_v56 }
 0x888   : > { %6434 = vmatprep.subr.msk.bf16.mxu1 %vm8329_vm7, %v6432_v55 }
 0x889   : > { %v2785_v32 = vpop.trf.xlu1 }
 0x88a   : > { %6109 = vmatprep.mubr.msk.f32.mxu1 %vm1296_vm1, %v2785_v32 }
 0x88d   : > { %v2786_v43 = vpop.trf.xlu1 }
 0x88e   : > { %6110 = vmatmul.mubr.msk.f32.gmra.mrb[10].mxu1 %vm1296_vm1, %v2786_v43 }
 0x891   : > { %v2787_v60 = vpop.trf.xlu1 }
 0x892   : > { %6112 = vmatprep.mubr.msk.f32.mxu1 %vm1296_vm1, %v2787_v60 }
 0x895   : > { %v2788_v57 = vpop.trf.xlu1 }
 0x896   : > { %6113 = vmatmul.mubr.msk.f32.gmra.mrb[12].mxu1 %vm1296_vm1, %v2788_v57 }
 0x899   : > { %v2789_v58 = vpop.trf.xlu1 }
 0x89a   : > { %6115 = vmatprep.mubr.msk.f32.mxu1 %vm1296_vm1, %v2789_v58 }
 0x89d   : > { %v2790_v61 = vpop.trf.xlu1 }
 0x89e   : > { %6116 = vmatmul.mubr.msk.f32.gmra.mrb[14].mxu1 %vm1296_vm1, %v2790_v61 }
 0x89f   : > { %6122 = vmatprep.mubr.msk.f32.mxu1 %vm1296_vm1, %v2952_v22 }
 0x8a2   : > { %6123 = vmatmul.mubr.msk.f32.vlgmr.msra.gmra.mrb[8].mxu1 %vm1296_vm1, %v2953_v44 }
 0x8a3   : > { %6437 = vmatpush3.bf16.xpose.msk.msra.mxu1 %vm8329_vm7, %v6432_v55  ;;  %6125 = vmatprep.mubr.msk.f32.mxu1 %vm1296_vm1, %v2954_v4 }
 0x8a4   : > { %6446 = vmatprep.subr.msk.bf16.mxu1 %vm8329_vm7, %v6432_v55 }
 0x8a6   : > { %6126 = vmatmul.mubr.msk.f32.gmra.mrb[10].mxu1 %vm1296_vm1, %v2955_v45  ;;  %v2760_v45 = vmul.f32 %v8278_v13, %v8399_v10 }
 0x8a7   : > { %6128 = vmatprep.mubr.msk.f32.mxu1 %vm1296_vm1, %v2956_v47 }
 0x8aa   : > { %6129 = vmatmul.mubr.msk.f32.gmra.mrb[12].mxu1 %vm1296_vm1, %v2957_v48  ;;  %v2759_v48 = vmul.f32 %v8278_v13, %v8397_v9  ;;  %v2764_v9 = vmul.f32 %v8278_v13, %v8459_v27  ;;  %v2765_v27 = vmul.f32 %v8278_v13, %v8473_v23 }
 0x8ab   : > { %6131 = vmatprep.mubr.msk.f32.mxu1 %vm1296_vm1, %v2958_v49 }
 0x8ad   : > { %v3303_v56 = vpop.permute.xlu1 %3302 }
 0x8ae   : > { %6132 = vmatmul.mubr.msk.f32.gmra.mrb[14].mxu1 %vm1296_vm1, %v2959_v50  ;;  %6160 = vmatmul.mubr.msk.f32.vlgmr.msra.gmra.mrb[22].mxu0 %vm1432_vm6, %v3303_v56 }
 0x8af   : > { %6138 = vmatprep.mubr.msk.f32.mxu1 %vm1432_vm6, %v3123_v39 }
 0x8b1   : > { %v3554_v21 = vpop.permute.xlu1 %3553 }
 0x8b2   : > { %6139 = vmatmul.mubr.msk.f32.vlgmr.msra.gmra.mrb[16].mxu1 %vm1432_vm6, %v8570_v31  ;;  %v7104_v31 = vpop.permute.xlu0 %7103 }
 0x8b3   : > { %6449 = vmatpush3.bf16.xpose.msk.msra.mxu1 %vm8329_vm7, %v6432_v55  ;;  %6152 = vmatprep.mubr.msk.f32.mxu1 %vm1432_vm6, %v3301_v28  ;;  %v7106_v39 = vunpack.i.h.bf16 %v7104_v31  ;;  %v7105_v7 = vunpack.i.l.bf16 %v7104_v31 }
 0x8b4   : > { %6457 = vmatprep.subr.bf16.mxu1 %v8621_v62 }
 0x8b5   : > { %v8697_v35 = vpop.permute.xlu1 %4298  ;;  %v6546_v8 = vpack.c.bf16 %v7106_v39, %v7105_v7 }
 0x8b9   : > { %v7109_v28 = vpop.permute.xlu1 %7108 }
 0x8ba   : > { %6153 = vmatmul.mubr.msk.f32.vlgmr.msra.gmra.mrb[18].mxu1 %vm1432_vm6, %v3303_v56  ;;  %v7111_v22 = vunpack.i.h.bf16 %v7109_v28  ;;  %v7110_v44 = vunpack.i.l.bf16 %v7109_v28 }
 0x8bb   : > { %6459 = vmatpush3.bf16.msra.mxu1 %v8621_v62 }
 0x8bc   : > { %6462 = vmatprep.subr.msk.bf16.mxu1 %vm8329_vm7, %v8635_v2  ;;  %v8702_v4 = vpack.c.bf16 %v7111_v22, %v7110_v44 }
 0x907   : > { %v6101_v5 = vpop.f32.mrb[18].mxu0 }
 0x908   : > { %2754 = vst.msk [vmem:[%s8185_s27 + $0x8] sm:$0xff] %vm1432_vm6, %v6101_v5  ;;  %v2742_v6 = vpop.f32.mrb[19].mxu0 }
 0x909   : > { %2753 = vst.msk [vmem:[%s8185_s27] sm:$0xff] %vm1432_vm6, %v2742_v6 }
 0x910   : > { %v6147_v15 = vpop.f32.mrb[20].mxu0 }
 0x911   : > { %v3289_v16 = vpop.f32.mrb[21].mxu0  ;;  %v3299_v20 = vsel %vm8422_vm10, %v6147_v15, 0.0 }
 0x912   : > { %v3298_v36 = vsel %vm8416_vm9, %v3289_v16, 0.0 }
 0x913   : > { %6166 = vmatprep.mubr.msk.f32.mxu1 %vm1296_vm1, %v3298_v36 }
 0x914   : > { %6167 = vmatmul.mubr.msk.f32.vlgmr.msra.gmra.mrb[20].mxu1 %vm1296_vm1, %v3299_v20 }
 0x915   : > { %6465 = vmatpush3.bf16.xpose.msk.msra.mxu1 %vm8329_vm7, %v8635_v2  ;;  %6185 = vmatprep.mubr.msk.f32.mxu1 %vm1432_vm6, %v3552_v40 }
 0x916   : > { %6468 = vmatprep.subr.msk.bf16.mxu1 %vm8329_vm7, %v8654_v19 }
 0x91d   : > { %6471 = vmatpush3.bf16.xpose.msk.msra.mxu1 %vm8329_vm7, %v8654_v19 }
 0x91e   : > { %6474 = vmatprep.subr.msk.bf16.mxu1 %vm8329_vm7, %v8673_v24 }
 0x925   : > { %6477 = vmatpush3.bf16.xpose.msk.msra.mxu1 %vm8329_vm7, %v8673_v24 }
 0x926   : > { %6480 = vmatprep.subr.msk.bf16.mxu1 %vm8329_vm7, %v8689_v29 }
 0x92d   : > { %6483 = vmatpush3.bf16.xpose.msk.msra.mxu1 %vm8329_vm7, %v8689_v29 }
 0x92e   : > { %6547 = vmatprep.subr.bf16.mxu1 %v6546_v8 }
 0x934   : > { %6186 = vmatmul.mubr.msk.f32.vlgmr.msra.gmra.mrb[20].mxu1 %vm1432_vm6, %v3554_v21 }
 0x935   : > { %6549 = vmatpush3.bf16.msra.mxu1 %v6546_v8 }
 0x936   : > { %6551 = vmatprep.subr.bf16.mxu1 %v8702_v4 }
 0x975   : > { %v6124_v47 = vpop.f32.mrb[8].mxu1 }
 0x976   : > { %v6554_v49 = vadd.f32 %v6124_v47, %v2760_v45  ;;  %v3058_v50 = vpop.f32.mrb[9].mxu1 }
 0x977   : > { %v6555_v51 = vadd.f32 %v3058_v50, %v2759_v48 }
 0x978   : > { %3106 = vst.msk [vmem:[#allocation2 + $0x8] sm:$0xff] %vm1432_vm6, %v6554_v49 }
 0x979   : > { %3105 = vst.msk [vmem:[#allocation2] sm:$0xff] %vm1432_vm6, %v6555_v51  ;;  %v6127_v26 = vpop.f32.mrb[10].mxu1 }
 0x97a   : > { %v6556_v3 = vadd.f32 %v6127_v26, %v2762_v52  ;;  %v3068_v10 = vpop.f32.mrb[11].mxu1 }
 0x97b   : > { %v6557_v55 = vadd.f32 %v3068_v10, %v2761_v54 }
 0x97c   : > { %3108 = vst.msk [vmem:[#allocation2 + $0x18] sm:$0xff] %vm1432_vm6, %v6556_v3 }
 0x97d   : > { %3107 = vst.msk [vmem:[#allocation2 + $0x10] sm:$0xff] %vm1432_vm6, %v6557_v55  ;;  %v6130_v32 = vpop.f32.mrb[12].mxu1 }
 0x97e   : > { %v6558_v43 = vadd.f32 %v6130_v32, %v2764_v9  ;;  %v3078_v60 = vpop.f32.mrb[13].mxu1 }
 0x97f   : > { %v6559_v57 = vadd.f32 %v3078_v60, %v2763_v18 }
 0x980   : > { %3110 = vst.msk [vmem:[#allocation2 + $0x28] sm:$0xff] %vm1432_vm6, %v6558_v43 }
 0x981   : > { %3109 = vst.msk [vmem:[#allocation2 + $0x20] sm:$0xff] %vm1432_vm6, %v6559_v57  ;;  %v6133_v58 = vpop.f32.mrb[14].mxu1  ;;  %v8726_v61 = vpop.f32.mrb[22].mxu0 }
 0x982   : > { %v6560_v56 = vadd.f32 %v6133_v58, %v2766_v17  ;;  %v3088_v5 = vpop.f32.mrb[15].mxu1  ;;  %v8730_v6 = vpop.f32.mrb[23].mxu0 }
 0x983   : > { %v6561_v25 = vadd.f32 %v3088_v5, %v2765_v27 }
 0x984   : > { %3112 = vst.msk [vmem:[#allocation2 + $0x38] sm:$0xff] %vm1432_vm6, %v6560_v56 }
 0x985   : > { %3111 = vst.msk [vmem:[#allocation2 + $0x30] sm:$0xff] %vm1432_vm6, %v6561_v25  ;;  %v6140_v15 = vpop.f32.mrb[16].mxu1 }
 0x986   : > { %v3204_v16 = vpop.f32.mrb[17].mxu1  ;;  %v3214_v39 = vsel %vm8422_vm10, %v6140_v15, 0.0 }
 0x987   : > { %v3213_v30 = vsel %vm8416_vm9, %v3204_v16, 0.0  ;;  %v6488_v36 = vpack.c.bf16 %v6140_v15, %v3204_v16 }
 0x988   : > { %6192 = vmatprep.mubr.msk.f32.mxu0 %vm1296_vm1, %v3213_v30 }
 0x98d   : > { %v8737_v20 = vpop.f32.mrb[18].mxu1 }
 0x98e   : > { %v3374_v23 = vpop.f32.mrb[19].mxu1  ;;  %v3384_v56 = vsel %vm8259_vm5, %v8737_v20, 0.0 }
 0x98f   : > { %v3383_v43 = vsel %vm8241_vm3, %v3374_v23, 0.0 }
 0xa07   : > { %v6187_v40 = vpop.f32.mrb[20].mxu1 }
 0xa08   : > { %v3649_v21 = vpop.f32.mrb[21].mxu1 }
 0xa09   : > { %v6484_v31 = vpack.c.bf16 %v6187_v40, %v3649_v21 }
 0xa0b   : > { %6485 = vmatprep.subr.bf16.mxu0 %v6484_v31 }
 0xa0c   : > { %6487 = vmatpush3.bf16.msra.mxu0 %v6484_v31 }
 0xa0d   : > { %6490 = vmatprep.subr.msk.bf16.mxu0 %vm8499_vm11, %v6488_v36 }
 0xa0f   : > { %6193 = vmatmul.mubr.msk.f32.vlgmr.msra.gmra.mrb[24].mxu0 %vm1296_vm1, %v3214_v39 }
 0xa10   : > { %6493 = vmatpush3.bf16.msk.msra.mxu0 %vm8499_vm11, %v6488_v36  ;;  %6199 = vmatprep.mubr.msk.f32.mxu0 %vm1296_vm1, %v3213_v30 }
 0xa13   : > { %6200 = vmatmul.mubr.msk.f32.vlgmr.msra.gmra.mrb[26].mxu0 %vm1296_vm1, %v3214_v39 }
 0xae2   : > { %v6194_v46 = vpop.f32.mrb[24].mxu0 }
 0xae3   : > { %v3740_v7 = vadd.f32 %v6194_v46, %v6187_v40  ;;  %v3730_v8 = vpop.f32.mrb[25].mxu0 }
 0xae4   : > { %v3739_v28 = vadd.f32 %v3730_v8, %v3649_v21 }
 0xae6   : > { %v6494_v22 = vpack.c.bf16 %v3740_v7, %v3739_v28  ;;  %v6201_v44 = vpop.f32.mrb[26].mxu0 }
 0xae7   : > { %v3807_v45 = vpop.f32.mrb[27].mxu0 }
 0xae8   : > { %v6498_v47 = vpack.c.bf16 %v6201_v44, %v3807_v45  ;;  %6495 = vmatprep.subr.bf16.mxu0 %v6494_v22  ;;  %6206 = vmatprep.mubr.msk.f32.mxu0 %vm1296_vm1, %v3807_v45 }
 0xae9   : > { %6497 = vmatpush3.bf16.msra.mxu0 %v6494_v22 }
 0xaea   : > { %6499 = vmatprep.subr.bf16.mxu0 %v6498_v47 }
 0xaec   : > { %6207 = vmatmul.mubr.msk.f32.vlgmr.msra.gmra.mrb[28].mxu0 %vm1296_vm1, %v6201_v44 }
 0xaed   : > { %6501 = vmatpush3.bf16.msra.mxu0 %v6498_v47  ;;  %6213 = vmatprep.mubr.msk.f32.mxu0 %vm1296_vm1, %v3807_v45 }
 0xaf0   : > { %6214 = vmatmul.mubr.msk.f32.vlgmr.msra.gmra.mrb[30].mxu0 %vm1296_vm1, %v6201_v44 }
 0xbbf   : > { %v6208_v11 = vpop.f32.mrb[28].mxu0 }
 0xbc0   : > { %v3898_v37 = vadd.f32 %v6208_v11, %v3740_v7  ;;  %v3888_v48 = vpop.f32.mrb[29].mxu0 }
 0xbc1   : > { %v3897_v49 = vadd.f32 %v3888_v48, %v3739_v28 }
 0xbc3   : > { %v6502_v50 = vpack.c.bf16 %v3898_v37, %v3897_v49  ;;  %v6215_v51 = vpop.f32.mrb[30].mxu0 }
 0xbc4   : > { %v3965_v52 = vpop.f32.mrb[31].mxu0 }
 0xbc5   : > { %v6506_v26 = vpack.c.bf16 %v6215_v51, %v3965_v52  ;;  %6503 = vmatprep.subr.bf16.mxu0 %v6502_v50  ;;  %6220 = vmatprep.mubr.msk.f32.mxu0 %vm1296_vm1, %v3965_v52 }
 0xbc6   : > { %6505 = vmatpush3.bf16.msra.mxu0 %v6502_v50 }
 0xbc7   : > { %6507 = vmatprep.subr.bf16.mxu0 %v6506_v26 }
 0xbc9   : > { %6221 = vmatmul.mubr.msk.f32.vlgmr.msra.gmra.mrb[32].mxu0 %vm1296_vm1, %v6215_v51 }
 0xbca   : > { %6509 = vmatpush3.bf16.msra.mxu0 %v6506_v26  ;;  %6227 = vmatprep.mubr.msk.f32.mxu0 %vm1296_vm1, %v3965_v52 }
 0xbcd   : > { %6228 = vmatmul.mubr.msk.f32.vlgmr.msra.gmra.mrb[34].mxu0 %vm1296_vm1, %v6215_v51 }
 0xc9c   : > { %v6222_v54 = vpop.f32.mrb[32].mxu0 }
 0xc9d   : > { %v4056_v3 = vadd.f32 %v6222_v54, %v3898_v37  ;;  %v4046_v10 = vpop.f32.mrb[33].mxu0  ;;  %v4854_v54 = vld [vmem:[#allocation2 + $0x18] sm:$0xff] (!%p5725_p12) }
 0xc9e   : > { %v4055_v55 = vadd.f32 %v4046_v10, %v3897_v49  ;;  %v4856_v10 = vld [vmem:[#allocation2 + $0x28] sm:$0xff] (!%p5725_p12)  ;;  %4870 = vst.msk [vmem:[%s8187_s12 + $0x18] sm:$0xff] (!%p5725_p12), %vm1432_vm6, %v4854_v54 }
 0xc9f   : > { %4872 = vst.msk [vmem:[%s8187_s12 + $0x28] sm:$0xff] (!%p5725_p12), %vm1432_vm6, %v4856_v10 }
 0xca0   : > { %v6510_v9 = vpack.c.bf16 %v4056_v3, %v4055_v55  ;;  %v6229_v32 = vpop.f32.mrb[34].mxu0 }
 0xca1   : > { %v4123_v18 = vpop.f32.mrb[35].mxu0 }
 0xca2   : > { %6511 = vmatprep.subr.bf16.mxu0 %v6510_v9  ;;  %6234 = vmatprep.mubr.msk.f32.mxu0 %vm1296_vm1, %v4123_v18 }
 0xca3   : > { %6513 = vmatpush3.bf16.msra.mxu0 %v6510_v9  ;;  %v4858_v9 = vld [vmem:[#allocation2 + $0x38] sm:$0xff] (!%p5725_p12) }
 0xca4   : > { %4874 = vst.msk [vmem:[%s8187_s12 + $0x38] sm:$0xff] (!%p5725_p12), %vm1432_vm6, %v4858_v9 }
 0xca6   : > { %6235 = vmatmul.mubr.msk.f32.vlgmr.msra.gmra.mrb[36].mxu0 %vm1296_vm1, %v6229_v32 }
 0xca7   : > { %6241 = vmatprep.mubr.msk.f32.mxu0 %vm1296_vm1, %v3383_v43 }
 0xd79   : > { %v6236_v60 = vpop.f32.mrb[36].mxu0 }
 0xd7a   : > { %v4214_v57 = vadd.f32 %v6236_v60, %v4056_v3  ;;  %v4204_v17 = vpop.f32.mrb[37].mxu0  ;;  %v4855_v3 = vld [vmem:[#allocation2 + $0x20] sm:$0xff] (!%p5725_p12) }
 0xd7b   : > { %v4213_v58 = vadd.f32 %v4204_v17, %v4055_v55  ;;  %4871 = vst.msk [vmem:[%s8187_s12 + $0x20] sm:$0xff] (!%p5725_p12), %vm1432_vm6, %v4855_v3  ;;  %v4857_v55 = vld [vmem:[#allocation2 + $0x30] sm:$0xff] (!%p5725_p12) }
 0xd7c   : > { %4873 = vst.msk [vmem:[%s8187_s12 + $0x30] sm:$0xff] (!%p5725_p12), %vm1432_vm6, %v4857_v55 }
 0xd7d   : > { %v6514_v27 = vpack.c.bf16 %v4214_v57, %v4213_v58  ;;  %4485 = vxpose.xlu0.b32.start [1/2] (short) (narrow) %v4213_v58, 64 }
 0xd7f   : > { %6515 = vmatprep.subr.bf16.mxu0 %v6514_v27 }
 0xd80   : > { %6517 = vmatpush3.bf16.msra.mxu0 %v6514_v27 }
 0xd81   : > { %4486 = vxpose.xlu0.b32.end [2/2] (short) (narrow) %v4214_v57, 64  ;;  %6520 = vmatprep.subr.msk.bf16.mxu0 %vm8329_vm7, %v8635_v2 }
 0xd83   : > { %6242 = vmatmul.mubr.msk.f32.vlgmr.msra.gmra.mrb[38].mxu0 %vm1296_vm1, %v3384_v56 }
 0xd84   : > { %6260 = vmatprep.mubr.msk.f32.mxu0 %vm1432_vm6, %v8681_v63 }
 0xd89   : > { %6523 = vmatpush3.bf16.xpose.msk.msra.mxu0 %vm8329_vm7, %v8635_v2  ;;  %v3460_v2 = vsel %vm8241_vm3, %v8730_v6, 0.0 }
 0xd8a   : > { %6526 = vmatprep.subr.msk.bf16.mxu0 %vm8329_vm7, %v8654_v19 }
 0xd91   : > { %6529 = vmatpush3.bf16.xpose.msk.msra.mxu0 %vm8329_vm7, %v8654_v19  ;;  %v3461_v19 = vsel %vm8259_vm5, %v8726_v61, 0.0 }
 0xd92   : > { %6532 = vmatprep.subr.msk.bf16.mxu0 %vm8329_vm7, %v8673_v24 }
 0xd99   : > { %6535 = vmatpush3.bf16.xpose.msk.msra.mxu0 %vm8329_vm7, %v8673_v24  ;;  %v4678_v24 = vpop.trf.xlu1 }
 0xd9a   : > { %6538 = vmatprep.subr.msk.bf16.mxu0 %vm8329_vm7, %v8689_v29 }
 0xda1   : > { %6541 = vmatpush3.bf16.xpose.msk.msra.mxu0 %vm8329_vm7, %v8689_v29 }
 0xda2   : > { %6543 = vmatprep.subr.bf16.mxu0 %v8621_v62 }
 0xda8   : > { %6261 = vmatmul.mubr.msk.f32.vlgmr.msra.gmra.mrb[38].mxu0 %vm1432_vm6, %v8697_v35 }
 0xda9   : > { %6545 = vmatpush3.bf16.msra.mxu0 %v8621_v62  ;;  %6267 = vmatprep.mubr.msk.f32.mxu0 %vm1296_vm1, %v3460_v2  ;;  %v4679_v62 = vpop.trf.xlu1 }
 0xdad   : > { %v4680_v29 = vpop.trf.xlu1 }
 0xdb0   : > { %6268 = vmatmul.mubr.msk.f32.vlgmr.msra.gmra.mrb[38].mxu0 %vm1296_vm1, %v3461_v19 }
 0xdc2   : > { %4474 = vrot.lane.b32.xlu0 %v8278_v13, %s7702_s24  ;;  %v4681_v13 = vpop.trf.xlu1 }
 0xdc6   : > { %v4682_v6 = vpop.trf.xlu1 }
 0xdca   : > { %v4683_v25 = vpop.trf.xlu1 }
 0xdce   : > { %v4684_v15 = vpop.trf.xlu1 }
 0xdd2   : > { %v4685_v16 = vpop.trf.xlu1 }
 0xdfd   : > { %v4501_v59 = vpop.trf.xlu0 }
 0xdfe   : > { %6274 = vmatprep.mubr.msk.f32.mxu1 %vm1296_vm1, %v4501_v59 }
 0xe01   : > { %v4502_v42 = vpop.trf.xlu0 }
 0xe02   : > { %6275 = vmatmul.mubr.msk.f32.vlgmr.msra.gmra.mrb[22].mxu1 %vm1296_vm1, %v4502_v42 }
 0xe03   : > { %6553 = vmatpush3.bf16.msra.mxu1 %v8702_v4 }
 0xe05   : > { %v4503_v63 = vpop.trf.xlu0 }
 0xe06   : > { %6277 = vmatprep.mubr.msk.f32.mxu1 %vm1296_vm1, %v4503_v63 }
 0xe09   : > { %v4504_v53 = vpop.trf.xlu0 }
 0xe0a   : > { %6278 = vmatmul.mubr.msk.f32.gmra.mrb[24].mxu1 %vm1296_vm1, %v4504_v53 }
 0xe0d   : > { %v4505_v35 = vpop.trf.xlu0 }
 0xe0e   : > { %6280 = vmatprep.mubr.msk.f32.mxu1 %vm1296_vm1, %v4505_v35 }
 0xe11   : > { %v4506_v61 = vpop.trf.xlu0 }
 0xe12   : > { %6281 = vmatmul.mubr.msk.f32.gmra.mrb[26].mxu1 %vm1296_vm1, %v4506_v61 }
 0xe15   : > { %v4507_v5 = vpop.trf.xlu0 }
 0xe16   : > { %6283 = vmatprep.mubr.msk.f32.mxu1 %vm1296_vm1, %v4507_v5 }
 0xe19   : > { %v4508_v4 = vpop.trf.xlu0 }
 0xe1a   : > { %6284 = vmatmul.mubr.msk.f32.gmra.mrb[28].mxu1 %vm1296_vm1, %v4508_v4 }
 0xe1b   : > { %6290 = vmatprep.mubr.msk.f32.mxu1 %vm1296_vm1, %v4678_v24 }
 0xe1e   : > { %6291 = vmatmul.mubr.msk.f32.vlgmr.msra.gmra.mrb[22].mxu1 %vm1296_vm1, %v4679_v62 }
 0xe1f   : > { %6293 = vmatprep.mubr.msk.f32.mxu1 %vm1296_vm1, %v4680_v29 }
 0xe22   : > { %6294 = vmatmul.mubr.msk.f32.gmra.mrb[24].mxu1 %vm1296_vm1, %v4681_v13 }
 0xe23   : > { %6296 = vmatprep.mubr.msk.f32.mxu1 %vm1296_vm1, %v4682_v6 }
 0xe26   : > { %6297 = vmatmul.mubr.msk.f32.gmra.mrb[26].mxu1 %vm1296_vm1, %v4683_v25 }
 0xe27   : > { %6299 = vmatprep.mubr.msk.f32.mxu1 %vm1296_vm1, %v4684_v15 }
 0xe2a   : > { %6300 = vmatmul.mubr.msk.f32.gmra.mrb[28].mxu1 %vm1296_vm1, %v4685_v16 }
 0xe34   : > { %v4475_v20 = vpop.permute.xlu0 %4474 }
 0xe35   : > { %v4478_v23 = vmul.f32 %v4475_v20, %v8631_v1  ;;  %v4477_v21 = vmul.f32 %v4475_v20, %v8629_v0  ;;  %v4480_v7 = vmul.f32 %v4475_v20, %v8648_v14  ;;  %v4479_v28 = vmul.f32 %v4475_v20, %v8646_v12 }
 0xe36   : > { %v4482_v47 = vmul.f32 %v4475_v20, %v8669_v34  ;;  %v4481_v11 = vmul.f32 %v4475_v20, %v8667_v33  ;;  %v4484_v12 = vmul.f32 %v4475_v20, %v8685_v38  ;;  %v4483_v51 = vmul.f32 %v4475_v20, %v8683_v41  ;;  %v4851_v33 = vld [vmem:[#allocation2] sm:$0xff] (!%p5725_p12)  ;;  %v4852_v41 = vld [vmem:[#allocation2 + $0x8] sm:$0xff] (!%p5725_p12)  ;;  %v4853_v38 = vld [vmem:[#allocation2 + $0x10] sm:$0xff] (!%p5725_p12) }
 0xe37   : > { %4867 = vst.msk [vmem:[%s8187_s12] sm:$0xff] (!%p5725_p12), %vm1432_vm6, %v4851_v33  ;;  %4868 = vst.msk [vmem:[%s8187_s12 + $0x8] sm:$0xff] (!%p5725_p12), %vm1432_vm6, %v4852_v41 }
 0xe38   : > { %4869 = vst.msk [vmem:[%s8187_s12 + $0x10] sm:$0xff] (!%p5725_p12), %vm1432_vm6, %v4853_v38 }
 0xe83   : > { %v6269_v30 = vpop.f32.mrb[38].mxu0 }
 0xe84   : > { %4466 = vrot.lane.b32.xlu0 %v6269_v30, %s7702_s24  ;;  %v4451_v36 = vpop.f32.mrb[39].mxu0 }
 0xe85   : > { %4464 = vrot.lane.b32.xlu1 %v4451_v36, %s7702_s24 }
 0xef1   : > { %v6292_v40 = vpop.f32.mrb[22].mxu1 }
 0xef2   : > { %v6562_v31 = vadd.f32 %v6292_v40, %v4478_v23  ;;  %v4792_v39 = vpop.f32.mrb[23].mxu1 }
 0xef3   : > { %v6563_v46 = vadd.f32 %v4792_v39, %v4477_v21 }
 0xef4   : > { %4840 = vst.msk [vmem:[#allocation2 + $0x48] sm:$0xff] %vm1432_vm6, %v6562_v31 }
 0xef5   : > { %4839 = vst.msk [vmem:[#allocation2 + $0x40] sm:$0xff] %vm1432_vm6, %v6563_v46  ;;  %v6295_v8 = vpop.f32.mrb[24].mxu1 }
 0xef6   : > { %v6564_v22 = vadd.f32 %v6295_v8, %v4480_v7  ;;  %v4802_v1 = vpop.f32.mrb[25].mxu1  ;;  %v4467_v44 = vpop.permute.xlu0 %4466 }
 0xef7   : > { %v6565_v45 = vadd.f32 %v4802_v1, %v4479_v28  ;;  %4472 = vst.msk [vmem:[%s8185_s27 + $0x8] sm:$0xff] %vm4470_vm12, %v4467_v44  ;;  %v4465_v0 = vpop.permute.xlu1 %4464 }
 0xef8   : > { %4842 = vst.msk [vmem:[#allocation2 + $0x58] sm:$0xff] %vm1432_vm6, %v6564_v22 }
 0xef9   : > { %4471 = vst.msk [vmem:[%s8185_s27] sm:$0xff] %vm4470_vm12, %v4465_v0  ;;  %v6298_v14 = vpop.f32.mrb[26].mxu1 }
 0xefa   : > { %4841 = vst.msk [vmem:[#allocation2 + $0x50] sm:$0xff] %vm1432_vm6, %v6565_v45  ;;  %v6566_v37 = vadd.f32 %v6298_v14, %v4482_v47  ;;  %v4812_v48 = vpop.f32.mrb[27].mxu1 }
 0xefb   : > { %v6567_v49 = vadd.f32 %v4812_v48, %v4481_v11  ;;  %4850 = sbr.rel (%p5725_p12) target bundleno = 3850 (0xf0a), region = 372  ;;  %v4860_v18 = vld [vmem:[#allocation2 + $0x48] sm:$0xff] (!%p5725_p12) }
 0xefc   : > { %4844 = vst.msk [vmem:[#allocation2 + $0x68] sm:$0xff] %vm1432_vm6, %v6566_v37  ;;  %v4859_v32 = vld [vmem:[#allocation2 + $0x40] sm:$0xff] (!%p5725_p12)  ;;  %4876 = vst.msk [vmem:[%s8187_s12 + $0x48] sm:$0xff] (!%p5725_p12), %vm1432_vm6, %v4860_v18 }
 0xefd   : > { %4843 = vst.msk [vmem:[#allocation2 + $0x60] sm:$0xff] %vm1432_vm6, %v6567_v49  ;;  %v6301_v50 = vpop.f32.mrb[28].mxu1  ;;  %4875 = vst.msk [vmem:[%s8187_s12 + $0x40] sm:$0xff] (!%p5725_p12), %vm1432_vm6, %v4859_v32 }
 0xefe   : > { %v6568_v52 = vadd.f32 %v6301_v50, %v4484_v12  ;;  %v4822_v26 = vpop.f32.mrb[29].mxu1 }
 0xeff   : > { %v6569_v34 = vadd.f32 %v4822_v26, %v4483_v51  ;;  %v4862_v60 = vld [vmem:[#allocation2 + $0x58] sm:$0xff] (!%p5725_p12) }
 0xf00   : > { %4846 = vst.msk [vmem:[#allocation2 + $0x78] sm:$0xff] %vm1432_vm6, %v6568_v52  ;;  %4878 = vst.msk [vmem:[%s8187_s12 + $0x58] sm:$0xff] (!%p5725_p12), %vm1432_vm6, %v4862_v60 }
 0xf01   : > { %4845 = vst.msk [vmem:[#allocation2 + $0x70] sm:$0xff] %vm1432_vm6, %v6569_v34  ;;  %v4861_v43 = vld [vmem:[#allocation2 + $0x50] sm:$0xff] (!%p5725_p12) }
 0xf02   : > { %4877 = vst.msk [vmem:[%s8187_s12 + $0x50] sm:$0xff] %vm1432_vm6, %v4861_v43 }
 0xf03   : > { %v4864_v17 = vld [vmem:[#allocation2 + $0x68] sm:$0xff] }
 0xf04   : > { %v4863_v57 = vld [vmem:[#allocation2 + $0x60] sm:$0xff]  ;;  %4880 = vst.msk [vmem:[%s8187_s12 + $0x68] sm:$0xff] %vm1432_vm6, %v4864_v17 }
 0xf05   : > { %4879 = vst.msk [vmem:[%s8187_s12 + $0x60] sm:$0xff] %vm1432_vm6, %v4863_v57 }
 0xf07   : > { %v4866_v27 = vld [vmem:[#allocation2 + $0x78] sm:$0xff] }
 0xf08   : > { %v4865_v58 = vld [vmem:[#allocation2 + $0x70] sm:$0xff]  ;;  %4882 = vst.msk [vmem:[%s8187_s12 + $0x78] sm:$0xff] %vm1432_vm6, %v4866_v27 }
 0xf09   : > { %4881 = vst.msk [vmem:[%s8187_s12 + $0x70] sm:$0xff] %vm1432_vm6, %v4865_v58 }
 0xf0a PF: > { %s8877_s28 = scalar_lea.sflag [#allocation11], %s1065_s20  ;;  %s9058_s23 = sld [smem:[#allocation25_spill]] }
 0xf10   : > { %p9059_p13 = scmp.ne.s32.totalorder %s9058_s23, 0 }
 0xf11   : > { %s5728_s16 = sshll.u32 (%p9059_p13), %s7488_s11, 1 }
 0xf12   : > { %4895 = sbr.rel (!%p9059_p13) target bundleno = 3897 (0xf39), region = 376  ;;  %s4897_s8 = ssub.s32 (%p9059_p13), 5, %s5728_s16 }
 0xf13   : > { %p4898_p4 = scmp.lt.s32.totalorder (%p9059_p13), %s4897_s8, 2 }
 0xf19   : > { %s9130_s8 = smov (!%p4898_p4, %s4897_s8), 2 }
 0xf1a   : > { %s8883_s17 = sshll.u32 %s9130_s8, 7 }
 0xf1b   : > { %s4902_s25 = ssub.s32 256, %s8883_s17 }
 0xf1c   : > { %4903 = vsyncadd %s8877_s28, %s4902_s25  ;;  %s9060_s26 = sld [smem:[#allocation20_spill]]  ;;  %p5730_p8 = scmp.ne.s32.totalorder %s8883_s17, 0 }
 0xf1d   : > { %s5760_s20 = sshll.u32 %s7488_s11, 2  ;;  %s4910_s18 = sshll.u32 %s8185_s27, 4  ;;  %s8891_s18 = int_to_ptr.vmem [resolvable:$true] %s4910_s18 }
 0xf1e   : > { %s9061_s16 = sld [smem:[#allocation31_spill]]  ;;  %s7158_s25 = scalar_lea.vmem %s8891_s18, %s8883_s17 }
 0xf1f   : > { %p7159_p11 = scmp.ne.s32.totalorder %s8891_s18, %s7158_s25  ;;  %s7703_s22 = smov [#allocation12]  }
 0xf20   : > { %s7162_s11 = sshll.u32 %s7703_s22, 4  ;;  %s7163_s11 = int_to_ptr.vmem [resolvable:$false] %s7162_s11 }
 0xf21   : > { %p7160_p0 = pnand %p7159_p11, %p5730_p8  ;;  %s7164_s27 = scalar_lea.vmem %s7163_s11, 512 }
 0xf22   : > { %s4906_s21 = sadd.s32 %s9060_s26, %s5760_s20  ;;  %p7165_p3 = scmp.lt.s32.totalorder %s8891_s18, %s7163_s11 }
 0xf23   : > { %s5732_s7 = sshll.u32 %s4906_s21, 7  ;;  %p7161_p2 = pneg %p7160_p0 }
 0xf24   : > { %s8896_s8 = scalar_lea.hbm %s9061_s16, %s5732_s7  ;;  %p7166_p5 = scmp.lt.s32.totalorder %s7164_s27, %s7158_s25 }
 0xf26   : > { %p7167_p6 = por %p7166_p5, %p7165_p3 }
 0xf28   : > { %p7168_p10 = pnand %p7167_p6, %p7161_p2 }
 0xf2a   : > { %7171 = shalt.err (!%p7168_p10)
}
 0xf2b   : > { %s7172_s26 = scalar_lea.hbm %s8896_s8, %s8883_s17  ;;  %s7176_s21 = scalar_lea.hbm %s9061_s16, 1280 }
 0xf2c   : > { %p7173_p1 = scmp.ne.s32.totalorder %s8896_s8, %s7172_s26  ;;  %p7177_p12 = scmp.lt.u32.totalorder %s8896_s8, %s9061_s16 }
 0xf2d   : > { %p7178_p13 = scmp.lt.u32.totalorder %s7176_s21, %s7172_s26  ;;  %p7180_p11 = scmp.lt.u32.totalorder %s7172_s26, %s8896_s8 }
 0xf2e   : > { %p7174_p9 = pnand %p7173_p1, %p5730_p8 }
 0xf2f   : > { %p7179_p4 = por %p7178_p13, %p7177_p12 }
 0xf30   : > { %p7175_p7 = pneg %p7174_p9 }
 0xf31   : > { %p7181_p0 = por %p7180_p11, %p7179_p4 }
 0xf33   : > { %p7182_p2 = pnand %p7181_p0, %p7175_p7 }
 0xf35   : > { %7185 = shalt.err (!%p7182_p2)
}
 0xf36   : > { %s7704_s23 = smov 128   ;;  %s7705_s25 = smov 256  }
 0xf37   : > { %s7706_s11 = smov 8  }
 0xf38   : > { %4916 = dma.vmem_to_hbm [thread:$0]  (%p5730_p8), %s8891_s18, %s8883_s17, %s8896_s8, %s8877_s28, %s7704_s23, %s7705_s25, %s7706_s11  }
 0xf39 PF: > { %s9062_s27 = sld [smem:[#allocation20_spill]]  ;;  %s9063_s20 = sld [smem:[#allocation26_spill]] }
 0xf3a   : > { %s4927_s21 = sshll.u32 %s8187_s12, 4  ;;  %s9064_s24 = sld [smem:[#allocation32_spill]]  ;;  %s8930_s21 = int_to_ptr.vmem [resolvable:$true] %s4927_s21 }
 0xf3b   : > { %s7186_s1 = scalar_lea.vmem %s8930_s21, 2048  ;;  %s7707_s28 = smov [#allocation13]  }
 0xf3c   : > { %p7187_p3 = scmp.ne.s32.totalorder %s8930_s21, %s7186_s1  ;;  %s7190_s17 = sshll.u32 %s7707_s28, 4  ;;  %s7191_s17 = int_to_ptr.vmem [resolvable:$false] %s7190_s17 }
 0xf3d   : > { %s7192_s18 = scalar_lea.vmem %s7191_s17, 4096  ;;  %p7193_p10 = scmp.lt.s32.totalorder %s8930_s21, %s7191_s17 }
 0xf3e   : > { %p7194_p1 = scmp.lt.s32.totalorder %s7192_s18, %s7186_s1 }
 0xf3f   : > { %s5762_s22 = sshll.u32 %s9062_s27, 11  ;;  %p9065_p5 = scmp.ne.s32.totalorder %s9063_s20, 0 }
 0xf40   : > { %s8928_s0 = scalar_lea.hbm %s9064_s24, %s5762_s22  ;;  %p7195_p9 = por %p7194_p1, %p7193_p10 }
 0xf41   : > { %p7188_p8 = pnand %p7187_p3, %p9065_p5 }
 0xf43   : > { %p7189_p6 = pneg %p7188_p8 }
 0xf45   : > { %p7196_p7 = pnand %p7195_p9, %p7189_p6 }
 0xf47   : > { %7199 = shalt.err (!%p7196_p7)
}
 0xf48   : > { %s7200_s12 = scalar_lea.hbm %s8928_s0, 2048  ;;  %s7204_s25 = scalar_lea.hbm %s9064_s24, 4096 }
 0xf49   : > { %p7201_p12 = scmp.ne.s32.totalorder %s8928_s0, %s7200_s12  ;;  %p7205_p11 = scmp.lt.u32.totalorder %s8928_s0, %s9064_s24 }
 0xf4a   : > { %p7206_p0 = scmp.lt.u32.totalorder %s7204_s25, %s7200_s12  ;;  %p7208_p3 = scmp.lt.u32.totalorder %s7200_s12, %s8928_s0 }
 0xf4b   : > { %p7202_p13 = pnand %p7201_p12, %p9065_p5 }
 0xf4c   : > { %p7207_p2 = por %p7206_p0, %p7205_p11 }
 0xf4d   : > { %p7203_p4 = pneg %p7202_p13 }
 0xf4e   : > { %p7209_p8 = por %p7208_p3, %p7207_p2 }
 0xf50   : > { %p7210_p6 = pnand %p7209_p8, %p7203_p4 }
 0xf52   : > { %7213 = shalt.err (!%p7210_p6)
}
 0xf53   : > { %s7708_s1 = smov 128   ;;  %s7709_s22 = smov 8  }
 0xf54   : > { %s9066_s26 = scalar_lea.sflag [#allocation14], %s8164_s19 }
 0xf55   : > { %6600 = dma.vmem_to_hbm [thread:$0]  (%p9065_p5), %s8930_s21, 2048, %s8928_s0, %s9066_s26, %s7708_s1, %s7708_s1, %s7709_s22  }
 0xf56 PF: > { %s9067_s7 = sld [smem:[#allocation18_spill]]  ;;  %s9068_s28 = sld [smem:[#allocation27_spill]] }
 0xf57   : > { %p6610_p10 = scmp.ge.s32.totalorder %s7504_s15, 2 }
 0xf5c   : > { %s4942_s17 = sand.u32 1, %s9067_s7   ;;  %p9069_p1 = scmp.ne.s32.totalorder %s9068_s28, 0 }
 0xf5d   : > { %s4943_s18 = scalar_lea.sflag [#allocation11], %s4942_s17 }
 0xf5e   : > { %p6604_p9 = pnand %p6610_p10, %p9069_p1 }
 0xf60   : > { %7455 = dma.done.wait (!%p6604_p9), %s4943_s18, 256  }
 0xf61   : > { %7457 = vsyncadd (!%p6604_p9), %s4943_s18, 4294967040  ;;  %s9070_s12 = sld [smem:[#allocation19_spill]]  ;;  %s9071_s8 = sld [smem:[#allocation28_spill]] }
 0xf67   : > { %s4951_s23 = sand.u32 1, %s9070_s12   ;;  %p9072_p7 = scmp.ne.s32.totalorder %s9071_s8, 0 }
 0xf68   : > { %s4952_s25 = scalar_lea.sflag [#allocation14], %s4951_s23 }
 0xf69   : > { %p6607_p12 = pnand %p6610_p10, %p9072_p7 }
 0xf6b   : > { %7459 = dma.done.wait (!%p6607_p12), %s4952_s25, 2048  }
 0xf6c   : > { %7461 = vsyncadd (!%p6607_p12), %s4952_s25, 4294965248  ;;  %s28_s15 = sadd.s32 1, %s7504_s15   ;;  %s9073_s0 = sld [smem:[#allocation23_spill]] }
 0xf6d   : > { %p25_p5 = scmp.ge.s32.totalorder %s28_s15, 8   ;;  %s9074_s19 = sld [smem:[#allocation24_spill]] }
 0xf6e   : > { %s9075_s20 = sld [smem:[#allocation21_spill]]  ;;  %s9076_s21 = sld [smem:[#allocation22_spill]] }
 0xf6f   : > { %s9077_s27 = smov %s7480_s9  ;;  %s9078_s28 = smov %s7472_s29 }
 0xf70   : > { %s9079_s29 = smov %s7476_s30  ;;  %s9081_s9 = smov %s7484_s10 }
 0xf71   : > { %s9083_s11 = smov %s7496_s13  ;;  %s9084_s12 = smov %s7500_s14 }
 0xf72   : > { %s9080_s30 = smov %s9073_s0  ;;  %27 = sbr.rel (!%p25_p5) target bundleno = 16 (0x10), region = 659 }
 0xf73   : > { %s9082_s10 = smov %s9074_s19 }
 0xf74   : > { %s9085_s13 = smov %s9075_s20  ;;  %s9086_s14 = smov %s9076_s21 }
 0xf79   :  { %4957 = vsyncpa [#allocation10], 1 }
 0xf7a   :  { %4959 = vsyncpa [#allocation10 + $0x1], 1 }
 0xf7b   :  { %4960 = vsyncpa [#allocation11], 1 }
 0xf7c   :  { %4962 = vsyncpa [#allocation11 + $0x1], 1 }
 0xf7d   :  { %4963 = vsyncpa [#allocation14], 1 }
 0xf7e   :  { %4965 = vsyncpa [#allocation14 + $0x1], 1 }

</bundles_post_ra>
